<compile_context>
chip_gen: v6e
topology: v6e:2x2x1
jax: 0.10.0
libtpu: 0.0.40
codegen_flags: <defaults>
</compile_context>

<pallas_src>
import functools

import jax
import jax.numpy as jnp
from jax.experimental import pallas as pl
from jax.experimental.pallas import tpu as pltpu

_CIN_PAD = 8      # pad the 3-channel input so enc1's K = 9*8 = 72 (even, 8-aligned)

try:
    _DEVICE_KIND = jax.devices()[0].device_kind.lower()
except Exception:
    _DEVICE_KIND = ""
# v6e / v7x have a 256-wide MXU; v5e (and older) are 128 wide.
_WIDE_MXU = any(tag in _DEVICE_KIND for tag in ("v6", "v7"))


def _round_up(x, m):
    return -(-x // m) * m


# ---------------------------------------------------------------------------
# Pallas kernels: matmul + bias + activation (+ fused BN statistics)
# ---------------------------------------------------------------------------
def _epilogue(y, b, act):
    y = y + b                                   # fp32 epilogue
    if act == "relu":
        return jnp.maximum(y, 0.0)
    if act == "sigmoid":
        return 1.0 / (1.0 + jnp.exp(-y))        # exact sigmoid (layer is mem-bound)
    return y


def _matmul_act_kernel(x_ref, w_ref, b_ref, o_ref, *, act):
    y = jnp.dot(x_ref[...], w_ref[...], preferred_element_type=jnp.float32)
    o_ref[...] = _epilogue(y, b_ref[...], act).astype(o_ref.dtype)


def _matmul_act_stats_kernel(x_ref, w_ref, b_ref, o_ref, stat_ref, *,
                             act, m_valid, tm):
    """Matmul + bias + act (bf16 store) + per-tile per-column (sum, sumsq)."""
    y = jnp.dot(x_ref[...], w_ref[...], preferred_element_type=jnp.float32)
    y = _epilogue(y, b_ref[...], act)
    o_ref[...] = y.astype(o_ref.dtype)                       # bf16 activation store
    # BN statistics from the f32 accumulator (before the bf16 cast); rows that
    # belong to ragged-M padding are masked out.
    row = pl.program_id(0) * tm + jax.lax.broadcasted_iota(jnp.int32, (tm, 1), 0)
    ym = jnp.where(row < m_valid, y, 0.0)
    s = jnp.sum(ym, axis=0, keepdims=True)                   # (1, TN)
    ss = jnp.sum(ym * ym, axis=0, keepdims=True)             # (1, TN)
    row_id = jax.lax.broadcasted_iota(jnp.int32, (8, 1), 0)
    stat_ref[0] = jnp.where(row_id == 0, s, jnp.where(row_id == 1, ss, 0.0))


# ---------------------------------------------------------------------------
# Kernel wrapper
# ---------------------------------------------------------------------------
def _pick_tiles(M, Np):
    # >= 2 M blocks whenever M >= 32 so both v7x TensorCores get work.
    tm = min(256, _round_up(max(-(-M // 2), 1), 16))
    # 256-wide N tile fills the v6e/v7x MXU; 128 matches v5e.
    tn = 256 if (_WIDE_MXU and Np % 256 == 0) else 128
    return tm, tn


def _vmem_limit(tm, k, tn):
    kl = _round_up(k, 128)                      # lane-padded VMEM footprint
    per_step = 2 * (tm * kl + kl * tn + tm * tn) + 4 * tn + 4 * 8 * tn
    # x2 double-buffering, x2 margin for layout padding / internal scratch,
    # floored at 16 MiB, capped well inside v7x's 64 MiB VMEM.
    return int(min(max(4 * per_step, 16 << 20), 48 << 20))


def matmul_bias_act(cols, w_p, b_p, act, *, emit_stats):
    """cols:(M,K) bf16; w_p:(K,Np) bf16 (Np multiple of 128); b_p:(1,Np) f32.

    Returns (y:(M,Np) bf16, stats:(grid_m,8,Np) f32 or None)."""
    cols = cols.astype(jnp.bfloat16)
    M, K = cols.shape
    Kw, Np = w_p.shape
    assert Kw == K, (Kw, K)
    tm, tn = _pick_tiles(M, Np)
    grid = (-(-M // tm), Np // tn)

    in_specs = [
        pl.BlockSpec((tm, K), lambda i, j: (i, 0)),
        pl.BlockSpec((K, tn), lambda i, j: (0, j)),
        pl.BlockSpec((1, tn), lambda i, j: (0, j)),
    ]
    cparams = pltpu.CompilerParams(
        dimension_semantics=("parallel", "parallel"),
        vmem_limit_bytes=_vmem_limit(tm, K, tn))

    if emit_stats:
        kernel = functools.partial(_matmul_act_stats_kernel, act=act,
                                   m_valid=M, tm=tm)
        out_shape = (jax.ShapeDtypeStruct((M, Np), jnp.bfloat16),
                     jax.ShapeDtypeStruct((grid[0], 8, Np), jnp.float32))
        out_specs = (pl.BlockSpec((tm, tn), lambda i, j: (i, j)),
                     pl.BlockSpec((1, 8, tn), lambda i, j: (i, 0, j)))
        y, stats = pl.pallas_call(
            kernel, out_shape=out_shape, grid=grid,
            in_specs=in_specs, out_specs=out_specs,
            compiler_params=cparams)(cols, w_p, b_p)
        return y, stats

    kernel = functools.partial(_matmul_act_kernel, act=act)
    y = pl.pallas_call(
        kernel,
        out_shape=jax.ShapeDtypeStruct((M, Np), jnp.bfloat16),
        grid=grid, in_specs=in_specs,
        out_specs=pl.BlockSpec((tm, tn), lambda i, j: (i, j)),
        compiler_params=cparams)(cols, w_p, b_p)
    return y, None


# ---------------------------------------------------------------------------
# Plain-JAX glue: im2col, pixel shuffle, BN scale/shift from fused stats
# ---------------------------------------------------------------------------
def _im2col(x_padded, k, stride):
    """x_padded: (N, Hp, Wp, C).  Returns (N*oh*ow, k*k*C), (N, oh, ow)."""
    N, Hp, Wp, C = x_padded.shape
    oh = (Hp - k) // stride + 1
    ow = (Wp - k) // stride + 1
    patches = []
    for i in range(k):
        for j in range(k):
            patches.append(
                x_padded[:, i:i + stride * (oh - 1) + 1:stride,
                         j:j + stride * (ow - 1) + 1:stride, :])
    p = jnp.stack(patches, axis=3)                          # (N, oh, ow, k*k, C)
    return p.reshape(N * oh * ow, k * k * C), (N, oh, ow)


def _pixel_shuffle(y_flat, n, h, w, cout_ch):
    """(n*h*w, 4*cout_ch) with columns (dy,dx,c) -> (n, 2h, 2w, cout_ch)."""
    y = y_flat.reshape(n, h, w, 2, 2, cout_ch)
    y = jnp.transpose(y, (0, 1, 3, 2, 4, 5))
    return y.reshape(n, 2 * h, 2 * w, cout_ch)


def _bn_scale_shift(stats, gamma, beta, n_cols, count, phases, eps=1e-5):
    """Reduce fused per-tile stats -> per-channel BN affine (training mode)."""
    s = jnp.sum(stats[:, 0, :n_cols], axis=0)
    ss = jnp.sum(stats[:, 1, :n_cols], axis=0)
    if phases > 1:                       # sub-pixel columns are (phase, channel)
        c = n_cols // phases
        s = s.reshape(phases, c).sum(axis=0)
        ss = ss.reshape(phases, c).sum(axis=0)
    mean = s / count
    var = ss / count - mean * mean       # biased batch variance
    scale = gamma * jax.lax.rsqrt(var + eps)
    shift = beta - mean * scale
    if phases > 1:
        scale = jnp.tile(scale, phases)
        shift = jnp.tile(shift, phases)
    return scale, shift


# ---------------------------------------------------------------------------
# Layer blocks
# ---------------------------------------------------------------------------
def _conv_bn_block(x_nhwc, w_p, b_p, gamma, beta, *, cout, stride, pad):
    xp = jnp.pad(x_nhwc, ((0, 0), (pad, pad), (pad, pad), (0, 0)))
    cols, (n, oh, ow) = _im2col(xp, 3, stride)
    y, stats = matmul_bias_act(cols, w_p, b_p, "relu", emit_stats=True)
    scale, shift = _bn_scale_shift(stats, gamma, beta, cout,
                                   count=n * oh * ow, phases=1)
    # BN affine in plain JAX: XLA fuses it with the next layer's pad + im2col
    # gather, so it adds no standalone HBM pass.
    y = (y[:, :cout].astype(jnp.float32) * scale + shift).astype(jnp.bfloat16)
    return y.reshape(n, oh, ow, cout)


def _deconv_bn_block(x_nhwc, w_p, b_p, gamma, beta, *, cout_ch):
    n, h, w, _ = x_nhwc.shape
    xp = jnp.pad(x_nhwc, ((0, 0), (0, 1), (0, 1), (0, 0)))   # sub-pixel needs +1 R/B
    cols, _ = _im2col(xp, 2, 1)
    y, stats = matmul_bias_act(cols, w_p, b_p, "relu", emit_stats=True)
    ncols = 4 * cout_ch
    scale, shift = _bn_scale_shift(stats, gamma, beta, ncols,
                                   count=4 * n * h * w, phases=4)
    y = (y[:, :ncols].astype(jnp.float32) * scale + shift).astype(jnp.bfloat16)
    return _pixel_shuffle(y, n, h, w, cout_ch)


def _deconv_sigmoid_block(x_nhwc, w_p, b_p, *, cout_ch):
    n, h, w, _ = x_nhwc.shape
    xp = jnp.pad(x_nhwc, ((0, 0), (0, 1), (0, 1), (0, 0)))
    cols, _ = _im2col(xp, 2, 1)
    y, _ = matmul_bias_act(cols, w_p, b_p, "sigmoid", emit_stats=False)
    return _pixel_shuffle(y[:, :4 * cout_ch], n, h, w, cout_ch)


# ---------------------------------------------------------------------------
# One-time parameter preprocessing (hoisted out of the forward pass)
# ---------------------------------------------------------------------------
def _pad_wb(w2, b):
    K, N = w2.shape
    Np = _round_up(N, 128)                      # lane-dense (unmasked) output stores
    w_p = jnp.pad(w2, ((0, 0), (0, Np - N))).astype(jnp.bfloat16)
    b_p = jnp.pad(b, (0, Np - N)).astype(jnp.float32).reshape(1, Np)
    return w_p, b_p


def prepare_params(p):
    def conv_w(w_pt, cin_pad=None):            # (Cout,Cin,3,3) -> (9*Cin', Cout)
        Cout, Cin, kh, kw = w_pt.shape
        if cin_pad is not None and cin_pad > Cin:
            w_pt = jnp.pad(w_pt, ((0, 0), (0, cin_pad - Cin), (0, 0), (0, 0)))
            Cin = cin_pad
        return jnp.transpose(w_pt, (2, 3, 1, 0)).reshape(kh * kw * Cin, Cout)

    def deconv_w(w_pt):                        # (Cin,Cout,3,3) -> sub-pixel (4*Cin, 4*Cout)
        Cin, Cout, _, _ = w_pt.shape
        blocks = []
        for ti in range(2):                    # tap = (ti, tj) of the 2x2 input window
            for tj in range(2):
                row = []
                for dy in range(2):            # phase = (dy, dx) of the 2x2 output block
                    for dx in range(2):
                        r, c = 1 + dy - 2 * ti, 1 + dx - 2 * tj
                        if 0 <= r <= 2 and 0 <= c <= 2:
                            row.append(w_pt[:, :, r, c])
                        else:
                            row.append(jnp.zeros((Cin, Cout), w_pt.dtype))
                blocks.append(jnp.concatenate(row, axis=1))
        return jnp.concatenate(blocks, axis=0)

    e1w, e1b = _pad_wb(conv_w(p["enc1_w"], cin_pad=_CIN_PAD), p["enc1_b"])
    e2w, e2b = _pad_wb(conv_w(p["enc2_w"]), p["enc2_b"])
    d1w, d1b = _pad_wb(deconv_w(p["dec1_w"]), jnp.tile(p["dec1_b"], 4))
    d2w, d2b = _pad_wb(deconv_w(p["dec2_w"]), jnp.tile(p["dec2_b"], 4))
    return {
        "enc1_w": e1w, "enc1_b": e1b, "enc2_w": e2w, "enc2_b": e2b,
        "dec1_w": d1w, "dec1_b": d1b, "dec2_w": d2w, "dec2_b": d2b,
        "bn1_g": p["bn1_g"], "bn1_b": p["bn1_b"],
        "bn2_g": p["bn2_g"], "bn2_b": p["bn2_b"],
        "bn3_g": p["bn3_g"], "bn3_b": p["bn3_b"],
    }


# ---------------------------------------------------------------------------
# Full forward (matches DenoiseAutoencoder.forward)
# ---------------------------------------------------------------------------
def denoise_autoencoder_forward(x_nchw, prep):
    x = jnp.transpose(x_nchw, (0, 2, 3, 1)).astype(jnp.bfloat16)      # -> NHWC bf16
    if x.shape[-1] < _CIN_PAD:                                        # 3 -> 8 channels
        x = jnp.pad(x, ((0, 0), (0, 0), (0, 0), (0, _CIN_PAD - x.shape[-1])))
    x = _conv_bn_block(x, prep["enc1_w"], prep["enc1_b"], prep["bn1_g"], prep["bn1_b"],
                       cout=64, stride=2, pad=1)
    x = _conv_bn_block(x, prep["enc2_w"], prep["enc2_b"], prep["bn2_g"], prep["bn2_b"],
                       cout=128, stride=2, pad=1)
    x = _deconv_bn_block(x, prep["dec1_w"], prep["dec1_b"], prep["bn3_g"], prep["bn3_b"],
                         cout_ch=64)
    x = _deconv_sigmoid_block(x, prep["dec2_w"], prep["dec2_b"], cout_ch=3)
    return jnp.transpose(x.astype(jnp.float32), (0, 3, 1, 2))         # -> NCHW


# ---------------------------------------------------------------------------
# Pure-JAX reference (lax conv, fp32) for a correctness sanity check
# ---------------------------------------------------------------------------
def _ref_forward(x_nchw, p):
    dn = ("NHWC", "HWIO", "NHWC")

    def bn(x, g, b):
        m = jnp.mean(x, axis=(0, 1, 2), keepdims=True)
        v = jnp.mean((x - m) ** 2, axis=(0, 1, 2), keepdims=True)
        return (x - m) * jax.lax.rsqrt(v + 1e-5) * g + b

    x = jnp.transpose(x_nchw, (0, 2, 3, 1)).astype(jnp.float32)
    w = jnp.transpose(p["enc1_w"], (2, 3, 1, 0))
    x = jax.lax.conv_general_dilated(x, w, (2, 2), ((1, 1), (1, 1)), dimension_numbers=dn) + p["enc1_b"]
    x = bn(jnp.maximum(x, 0.0), p["bn1_g"], p["bn1_b"])
    w = jnp.transpose(p["enc2_w"], (2, 3, 1, 0))
    x = jax.lax.conv_general_dilated(x, w, (2, 2), ((1, 1), (1, 1)), dimension_numbers=dn) + p["enc2_b"]
    x = bn(jnp.maximum(x, 0.0), p["bn2_g"], p["bn2_b"])
    w = jnp.transpose(jnp.flip(p["dec1_w"], (2, 3)), (2, 3, 0, 1))
    x = jax.lax.conv_general_dilated(x, w, (1, 1), ((1, 2), (1, 2)), lhs_dilation=(2, 2),
                                     dimension_numbers=dn) + p["dec1_b"]
    x = bn(jnp.maximum(x, 0.0), p["bn3_g"], p["bn3_b"])
    w = jnp.transpose(jnp.flip(p["dec2_w"], (2, 3)), (2, 3, 0, 1))
    x = jax.lax.conv_general_dilated(x, w, (1, 1), ((1, 2), (1, 2)), lhs_dilation=(2, 2),
                                     dimension_numbers=dn) + p["dec2_b"]
    x = jax.nn.sigmoid(x)
    return jnp.transpose(x, (0, 3, 1, 2))


# ---------------------------------------------------------------------------
# Deterministic parameter init + driver
# ---------------------------------------------------------------------------
def init_params(key):
    ks = jax.random.split(key, 8)
    f32 = jnp.float32
    return {
        "enc1_w": 0.1 * jax.random.normal(ks[0], (64, 3, 3, 3), f32),
        "enc1_b": 0.1 * jax.random.normal(ks[1], (64,), f32),
        "bn1_g": jnp.ones((64,), f32), "bn1_b": jnp.zeros((64,), f32),
        "enc2_w": 0.05 * jax.random.normal(ks[2], (128, 64, 3, 3), f32),
        "enc2_b": 0.1 * jax.random.normal(ks[3], (128,), f32),
        "bn2_g": jnp.ones((128,), f32), "bn2_b": jnp.zeros((128,), f32),
        "dec1_w": 0.05 * jax.random.normal(ks[4], (128, 64, 3, 3), f32),
        "dec1_b": 0.1 * jax.random.normal(ks[5], (64,), f32),
        "bn3_g": jnp.ones((64,), f32), "bn3_b": jnp.zeros((64,), f32),
        "dec2_w": 0.05 * jax.random.normal(ks[6], (64, 3, 3, 3), f32),
        "dec2_b": 0.1 * jax.random.normal(ks[7], (3,), f32),
    }


if __name__ == "__main__":
    key = jax.random.PRNGKey(0)
    k_x, k_p = jax.random.split(key)
    x = jax.random.normal(k_x, (2, 3, 16, 16), jnp.float32)   # NCHW, like PyTorch
    params = init_params(k_p)
    prep = prepare_params(params)                             # one-time weight prep

    fwd = jax.jit(denoise_autoencoder_forward)
    out = jax.block_until_ready(fwd(x, prep))
    assert out.shape == (2, 3, 16, 16), out.shape

    ref = jax.block_until_ready(_ref_forward(x, params))
    max_err = float(jnp.max(jnp.abs(out - ref)))
    # bf16 MXU operands + bf16 intermediate activations
    assert max_err < 4e-2, f"mismatch vs reference: {max_err}"

    print("KERNEL_OK")
</pallas_src>

<mosaic_0001>
module attributes {stable_mosaic.version = 11 : i64} {
  func.func @_matmul_act_stats_kernel(%arg0: i32, %arg1: i32, %arg2: memref<64x72xbf16, #tpu.memory_space<vmem>>, %arg3: memref<72x128xbf16, #tpu.memory_space<vmem>>, %arg4: memref<1x128xf32, #tpu.memory_space<vmem>>, %arg5: memref<64x128xbf16, #tpu.memory_space<vmem>>, %arg6: memref<1x8x128xf32, #tpu.memory_space<vmem>>) attributes {dimension_semantics = [#tpu.dimension_semantics<parallel>, #tpu.dimension_semantics<parallel>], iteration_bounds = array<i64: 2, 1>, scalar_prefetch = 0 : i64, scratch_operands = 0 : i64, tpu.core_type = #tpu.core_type<tc>, window_params = [{transform_indices = @transform_0, window_bounds = array<i64: 64, 72>}, {transform_indices = @transform_1, window_bounds = array<i64: 72, 128>}, {transform_indices = @transform_2, window_bounds = array<i64: 1, 128>}, {transform_indices = @transform_3, window_bounds = array<i64: 64, 128>}, {transform_indices = @transform_4, window_bounds = array<i64: 1, 8, 128>}]} {
    %c0 = arith.constant 0 : index
    %c0_0 = arith.constant 0 : index
    %0 = vector.load %arg2[%c0, %c0_0] : memref<64x72xbf16, #tpu.memory_space<vmem>>, vector<64x72xbf16>
    %c0_1 = arith.constant 0 : index
    %c0_2 = arith.constant 0 : index
    %1 = vector.load %arg3[%c0_1, %c0_2] : memref<72x128xbf16, #tpu.memory_space<vmem>>, vector<72x128xbf16>
    %cst = arith.constant dense<0.000000e+00> : vector<64x128xf32>
    %2 = tpu.matmul %0, %1, %cst {dimension_numbers = #tpu.dot_dimension_numbers<[1], [0], [0], [1], [0, 0, 1, 1], [], []>} : vector<64x72xbf16>, vector<72x128xbf16>, vector<64x128xf32> -> vector<64x128xf32>
    %c0_3 = arith.constant 0 : index
    %c0_4 = arith.constant 0 : index
    %3 = vector.load %arg4[%c0_3, %c0_4] : memref<1x128xf32, #tpu.memory_space<vmem>>, vector<1x128xf32>
    %4 = vector.broadcast %3 : vector<1x128xf32> to vector<64x128xf32>
    %5 = arith.addf %2, %4 : vector<64x128xf32>
    %cst_5 = arith.constant 0.000000e+00 : f32
    %6 = vector.broadcast %cst_5 : f32 to vector<64x128xf32>
    %7 = arith.maximumf %5, %6 : vector<64x128xf32>
    %8 = arith.truncf %7 : vector<64x128xf32> to vector<64x128xbf16>
    %c0_6 = arith.constant 0 : index
    %c0_7 = arith.constant 0 : index
    %9 = vector.load %arg5[%c0_6, %c0_7] : memref<64x128xbf16, #tpu.memory_space<vmem>>, vector<64x128xbf16>
    tpu.vector_store %arg5[%c0_6, %c0_7], %8 {strides = array<i32>} : memref<64x128xbf16, #tpu.memory_space<vmem>>, vector<64x128xbf16>,
    %c64_i32 = arith.constant 64 : i32
    %10 = arith.muli %arg0, %c64_i32 : i32
    %11 = tpu.iota {dimensions = array<i32: 0>} : vector<64x1xi32>
    %12 = vector.broadcast %10 : i32 to vector<64x1xi32>
    %13 = arith.addi %12, %11 : vector<64x1xi32>
    %c128_i32 = arith.constant 128 : i32
    %14 = vector.broadcast %c128_i32 : i32 to vector<64x1xi32>
    %15 = arith.cmpi slt, %13, %14 : vector<64x1xi32>
    %cst_8 = arith.constant 0.000000e+00 : f32
    %16 = vector.shape_cast %15 : vector<64x1xi1> to vector<64x1xi1>
    %17 = vector.broadcast %16 : vector<64x1xi1> to vector<64x128xi1>
    %18 = vector.broadcast %cst_8 : f32 to vector<64x128xf32>
    %19 = arith.select %17, %7, %18 : vector<64x128xi1>, vector<64x128xf32>
    %cst_9 = arith.constant dense<0.000000e+00> : vector<128xf32>
    %20 = vector.multi_reduction <add>, %19, %cst_9 [0] : vector<64x128xf32> to vector<128xf32>
    %21 = vector.shape_cast %20 : vector<128xf32> to vector<1x128xf32>
    %22 = arith.mulf %19, %19 : vector<64x128xf32>
    %cst_10 = arith.constant dense<0.000000e+00> : vector<128xf32>
    %23 = vector.multi_reduction <add>, %22, %cst_10 [0] : vector<64x128xf32> to vector<128xf32>
    %24 = vector.shape_cast %23 : vector<128xf32> to vector<1x128xf32>
    %25 = tpu.iota {dimensions = array<i32: 0>} : vector<8x1xi32>
    %c0_i32 = arith.constant 0 : i32
    %26 = vector.broadcast %c0_i32 : i32 to vector<8x1xi32>
    %27 = arith.cmpi eq, %25, %26 : vector<8x1xi32>
    %c1_i32 = arith.constant 1 : i32
    %28 = vector.broadcast %c1_i32 : i32 to vector<8x1xi32>
    %29 = arith.cmpi eq, %25, %28 : vector<8x1xi32>
    %cst_11 = arith.constant 0.000000e+00 : f32
    %30 = vector.shape_cast %29 : vector<8x1xi1> to vector<8x1xi1>
    %31 = vector.broadcast %30 : vector<8x1xi1> to vector<8x128xi1>
    %32 = vector.shape_cast %24 : vector<1x128xf32> to vector<1x128xf32>
    %33 = vector.broadcast %32 : vector<1x128xf32> to vector<8x128xf32>
    %34 = vector.broadcast %cst_11 : f32 to vector<8x128xf32>
    %35 = arith.select %31, %33, %34 : vector<8x128xi1>, vector<8x128xf32>
    %36 = vector.shape_cast %27 : vector<8x1xi1> to vector<8x1xi1>
    %37 = vector.broadcast %36 : vector<8x1xi1> to vector<8x128xi1>
    %38 = vector.shape_cast %21 : vector<1x128xf32> to vector<1x128xf32>
    %39 = vector.broadcast %38 : vector<1x128xf32> to vector<8x128xf32>
    %40 = arith.select %37, %39, %35 : vector<8x128xi1>, vector<8x128xf32>
    %c0_12 = arith.constant 0 : index
    %c0_13 = arith.constant 0 : index
    %c0_14 = arith.constant 0 : index
    %41 = vector.load %arg6[%c0_12, %c0_13, %c0_14] : memref<1x8x128xf32, #tpu.memory_space<vmem>>, vector<1x8x128xf32>
    %42 = vector.shape_cast %41 : vector<1x8x128xf32> to vector<8x128xf32>
    %43 = vector.shape_cast %40 : vector<8x128xf32> to vector<1x8x128xf32>
    tpu.vector_store %arg6[%c0_12, %c0_13, %c0_14], %43 {strides = array<i32>} : memref<1x8x128xf32, #tpu.memory_space<vmem>>, vector<1x8x128xf32>,
    return
  }
  func.func @transform_0(%arg0: i32, %arg1: i32) -> (i32, i32) {
    %c0_i32 = arith.constant 0 : i32
    %c0_i32_0 = arith.constant 0 : i32
    return %arg0, %c0_i32 : i32, i32
  }
  func.func @transform_1(%arg0: i32, %arg1: i32) -> (i32, i32) {
    %c0_i32 = arith.constant 0 : i32
    %c0_i32_0 = arith.constant 0 : i32
    return %c0_i32, %arg1 : i32, i32
  }
  func.func @transform_2(%arg0: i32, %arg1: i32) -> (i32, i32) {
    %c0_i32 = arith.constant 0 : i32
    %c0_i32_0 = arith.constant 0 : i32
    return %c0_i32, %arg1 : i32, i32
  }
  func.func @transform_3(%arg0: i32, %arg1: i32) -> (i32, i32) {
    %c0_i32 = arith.constant 0 : i32
    return %arg0, %arg1 : i32, i32
  }
  func.func @transform_4(%arg0: i32, %arg1: i32) -> (i32, i32, i32) {
    %c0_i32 = arith.constant 0 : i32
    %c0_i32_0 = arith.constant 0 : i32
    return %arg0, %c0_i32, %arg1 : i32, i32, i32
  }
}

module attributes {stable_mosaic.version = 11 : i64} {
  func.func @_matmul_act_stats_kernel(%arg0: i32, %arg1: i32, %arg2: memref<16x576xbf16, #tpu.memory_space<vmem>>, %arg3: memref<576x128xbf16, #tpu.memory_space<vmem>>, %arg4: memref<1x128xf32, #tpu.memory_space<vmem>>, %arg5: memref<16x128xbf16, #tpu.memory_space<vmem>>, %arg6: memref<1x8x128xf32, #tpu.memory_space<vmem>>) attributes {dimension_semantics = [#tpu.dimension_semantics<parallel>, #tpu.dimension_semantics<parallel>], iteration_bounds = array<i64: 2, 1>, scalar_prefetch = 0 : i64, scratch_operands = 0 : i64, tpu.core_type = #tpu.core_type<tc>, window_params = [{transform_indices = @transform_0, window_bounds = array<i64: 16, 576>}, {transform_indices = @transform_1, window_bounds = array<i64: 576, 128>}, {transform_indices = @transform_2, window_bounds = array<i64: 1, 128>}, {transform_indices = @transform_3, window_bounds = array<i64: 16, 128>}, {transform_indices = @transform_4, window_bounds = array<i64: 1, 8, 128>}]} {
    %c0 = arith.constant 0 : index
    %c0_0 = arith.constant 0 : index
    %0 = vector.load %arg2[%c0, %c0_0] : memref<16x576xbf16, #tpu.memory_space<vmem>>, vector<16x576xbf16>
    %c0_1 = arith.constant 0 : index
    %c0_2 = arith.constant 0 : index
    %1 = vector.load %arg3[%c0_1, %c0_2] : memref<576x128xbf16, #tpu.memory_space<vmem>>, vector<576x128xbf16>
    %cst = arith.constant dense<0.000000e+00> : vector<16x128xf32>
    %2 = tpu.matmul %0, %1, %cst {dimension_numbers = #tpu.dot_dimension_numbers<[1], [0], [0], [1], [0, 0, 1, 1], [], []>} : vector<16x576xbf16>, vector<576x128xbf16>, vector<16x128xf32> -> vector<16x128xf32>
    %c0_3 = arith.constant 0 : index
    %c0_4 = arith.constant 0 : index
    %3 = vector.load %arg4[%c0_3, %c0_4] : memref<1x128xf32, #tpu.memory_space<vmem>>, vector<1x128xf32>
    %4 = vector.broadcast %3 : vector<1x128xf32> to vector<16x128xf32>
    %5 = arith.addf %2, %4 : vector<16x128xf32>
    %cst_5 = arith.constant 0.000000e+00 : f32
    %6 = vector.broadcast %cst_5 : f32 to vector<16x128xf32>
    %7 = arith.maximumf %5, %6 : vector<16x128xf32>
    %8 = arith.truncf %7 : vector<16x128xf32> to vector<16x128xbf16>
    %c0_6 = arith.constant 0 : index
    %c0_7 = arith.constant 0 : index
    %9 = vector.load %arg5[%c0_6, %c0_7] : memref<16x128xbf16, #tpu.memory_space<vmem>>, vector<16x128xbf16>
    tpu.vector_store %arg5[%c0_6, %c0_7], %8 {strides = array<i32>} : memref<16x128xbf16, #tpu.memory_space<vmem>>, vector<16x128xbf16>,
    %c16_i32 = arith.constant 16 : i32
    %10 = arith.muli %arg0, %c16_i32 : i32
    %11 = tpu.iota {dimensions = array<i32: 0>} : vector<16x1xi32>
    %12 = vector.broadcast %10 : i32 to vector<16x1xi32>
    %13 = arith.addi %12, %11 : vector<16x1xi32>
    %c32_i32 = arith.constant 32 : i32
    %14 = vector.broadcast %c32_i32 : i32 to vector<16x1xi32>
    %15 = arith.cmpi slt, %13, %14 : vector<16x1xi32>
    %cst_8 = arith.constant 0.000000e+00 : f32
    %16 = vector.shape_cast %15 : vector<16x1xi1> to vector<16x1xi1>
    %17 = vector.broadcast %16 : vector<16x1xi1> to vector<16x128xi1>
    %18 = vector.broadcast %cst_8 : f32 to vector<16x128xf32>
    %19 = arith.select %17, %7, %18 : vector<16x128xi1>, vector<16x128xf32>
    %cst_9 = arith.constant dense<0.000000e+00> : vector<128xf32>
    %20 = vector.multi_reduction <add>, %19, %cst_9 [0] : vector<16x128xf32> to vector<128xf32>
    %21 = vector.shape_cast %20 : vector<128xf32> to vector<1x128xf32>
    %22 = arith.mulf %19, %19 : vector<16x128xf32>
    %cst_10 = arith.constant dense<0.000000e+00> : vector<128xf32>
    %23 = vector.multi_reduction <add>, %22, %cst_10 [0] : vector<16x128xf32> to vector<128xf32>
    %24 = vector.shape_cast %23 : vector<128xf32> to vector<1x128xf32>
    %25 = tpu.iota {dimensions = array<i32: 0>} : vector<8x1xi32>
    %c0_i32 = arith.constant 0 : i32
    %26 = vector.broadcast %c0_i32 : i32 to vector<8x1xi32>
    %27 = arith.cmpi eq, %25, %26 : vector<8x1xi32>
    %c1_i32 = arith.constant 1 : i32
    %28 = vector.broadcast %c1_i32 : i32 to vector<8x1xi32>
    %29 = arith.cmpi eq, %25, %28 : vector<8x1xi32>
    %cst_11 = arith.constant 0.000000e+00 : f32
    %30 = vector.shape_cast %29 : vector<8x1xi1> to vector<8x1xi1>
    %31 = vector.broadcast %30 : vector<8x1xi1> to vector<8x128xi1>
    %32 = vector.shape_cast %24 : vector<1x128xf32> to vector<1x128xf32>
    %33 = vector.broadcast %32 : vector<1x128xf32> to vector<8x128xf32>
    %34 = vector.broadcast %cst_11 : f32 to vector<8x128xf32>
    %35 = arith.select %31, %33, %34 : vector<8x128xi1>, vector<8x128xf32>
    %36 = vector.shape_cast %27 : vector<8x1xi1> to vector<8x1xi1>
    %37 = vector.broadcast %36 : vector<8x1xi1> to vector<8x128xi1>
    %38 = vector.shape_cast %21 : vector<1x128xf32> to vector<1x128xf32>
    %39 = vector.broadcast %38 : vector<1x128xf32> to vector<8x128xf32>
    %40 = arith.select %37, %39, %35 : vector<8x128xi1>, vector<8x128xf32>
    %c0_12 = arith.constant 0 : index
    %c0_13 = arith.constant 0 : index
    %c0_14 = arith.constant 0 : index
    %41 = vector.load %arg6[%c0_12, %c0_13, %c0_14] : memref<1x8x128xf32, #tpu.memory_space<vmem>>, vector<1x8x128xf32>
    %42 = vector.shape_cast %41 : vector<1x8x128xf32> to vector<8x128xf32>
    %43 = vector.shape_cast %40 : vector<8x128xf32> to vector<1x8x128xf32>
    tpu.vector_store %arg6[%c0_12, %c0_13, %c0_14], %43 {strides = array<i32>} : memref<1x8x128xf32, #tpu.memory_space<vmem>>, vector<1x8x128xf32>,
    return
  }
  func.func @transform_0(%arg0: i32, %arg1: i32) -> (i32, i32) {
    %c0_i32 = arith.constant 0 : i32
    %c0_i32_0 = arith.constant 0 : i32
    return %arg0, %c0_i32 : i32, i32
  }
  func.func @transform_1(%arg0: i32, %arg1: i32) -> (i32, i32) {
    %c0_i32 = arith.constant 0 : i32
    %c0_i32_0 = arith.constant 0 : i32
    return %c0_i32, %arg1 : i32, i32
  }
  func.func @transform_2(%arg0: i32, %arg1: i32) -> (i32, i32) {
    %c0_i32 = arith.constant 0 : i32
    %c0_i32_0 = arith.constant 0 : i32
    return %c0_i32, %arg1 : i32, i32
  }
  func.func @transform_3(%arg0: i32, %arg1: i32) -> (i32, i32) {
    %c0_i32 = arith.constant 0 : i32
    return %arg0, %arg1 : i32, i32
  }
  func.func @transform_4(%arg0: i32, %arg1: i32) -> (i32, i32, i32) {
    %c0_i32 = arith.constant 0 : i32
    %c0_i32_0 = arith.constant 0 : i32
    return %arg0, %c0_i32, %arg1 : i32, i32, i32
  }
}

module attributes {stable_mosaic.version = 11 : i64} {
  func.func @_matmul_act_stats_kernel(%arg0: i32, %arg1: i32, %arg2: memref<16x512xbf16, #tpu.memory_space<vmem>>, %arg3: memref<512x128xbf16, #tpu.memory_space<vmem>>, %arg4: memref<1x128xf32, #tpu.memory_space<vmem>>, %arg5: memref<16x128xbf16, #tpu.memory_space<vmem>>, %arg6: memref<1x8x128xf32, #tpu.memory_space<vmem>>) attributes {dimension_semantics = [#tpu.dimension_semantics<parallel>, #tpu.dimension_semantics<parallel>], iteration_bounds = array<i64: 2, 2>, scalar_prefetch = 0 : i64, scratch_operands = 0 : i64, tpu.core_type = #tpu.core_type<tc>, window_params = [{transform_indices = @transform_0, window_bounds = array<i64: 16, 512>}, {transform_indices = @transform_1, window_bounds = array<i64: 512, 128>}, {transform_indices = @transform_2, window_bounds = array<i64: 1, 128>}, {transform_indices = @transform_3, window_bounds = array<i64: 16, 128>}, {transform_indices = @transform_4, window_bounds = array<i64: 1, 8, 128>}]} {
    %c0 = arith.constant 0 : index
    %c0_0 = arith.constant 0 : index
    %0 = vector.load %arg2[%c0, %c0_0] : memref<16x512xbf16, #tpu.memory_space<vmem>>, vector<16x512xbf16>
    %c0_1 = arith.constant 0 : index
    %c0_2 = arith.constant 0 : index
    %1 = vector.load %arg3[%c0_1, %c0_2] : memref<512x128xbf16, #tpu.memory_space<vmem>>, vector<512x128xbf16>
    %cst = arith.constant dense<0.000000e+00> : vector<16x128xf32>
    %2 = tpu.matmul %0, %1, %cst {dimension_numbers = #tpu.dot_dimension_numbers<[1], [0], [0], [1], [0, 0, 1, 1], [], []>} : vector<16x512xbf16>, vector<512x128xbf16>, vector<16x128xf32> -> vector<16x128xf32>
    %c0_3 = arith.constant 0 : index
    %c0_4 = arith.constant 0 : index
    %3 = vector.load %arg4[%c0_3, %c0_4] : memref<1x128xf32, #tpu.memory_space<vmem>>, vector<1x128xf32>
    %4 = vector.broadcast %3 : vector<1x128xf32> to vector<16x128xf32>
    %5 = arith.addf %2, %4 : vector<16x128xf32>
    %cst_5 = arith.constant 0.000000e+00 : f32
    %6 = vector.broadcast %cst_5 : f32 to vector<16x128xf32>
    %7 = arith.maximumf %5, %6 : vector<16x128xf32>
    %8 = arith.truncf %7 : vector<16x128xf32> to vector<16x128xbf16>
    %c0_6 = arith.constant 0 : index
    %c0_7 = arith.constant 0 : index
    %9 = vector.load %arg5[%c0_6, %c0_7] : memref<16x128xbf16, #tpu.memory_space<vmem>>, vector<16x128xbf16>
    tpu.vector_store %arg5[%c0_6, %c0_7], %8 {strides = array<i32>} : memref<16x128xbf16, #tpu.memory_space<vmem>>, vector<16x128xbf16>,
    %c16_i32 = arith.constant 16 : i32
    %10 = arith.muli %arg0, %c16_i32 : i32
    %11 = tpu.iota {dimensions = array<i32: 0>} : vector<16x1xi32>
    %12 = vector.broadcast %10 : i32 to vector<16x1xi32>
    %13 = arith.addi %12, %11 : vector<16x1xi32>
    %c32_i32 = arith.constant 32 : i32
    %14 = vector.broadcast %c32_i32 : i32 to vector<16x1xi32>
    %15 = arith.cmpi slt, %13, %14 : vector<16x1xi32>
    %cst_8 = arith.constant 0.000000e+00 : f32
    %16 = vector.shape_cast %15 : vector<16x1xi1> to vector<16x1xi1>
    %17 = vector.broadcast %16 : vector<16x1xi1> to vector<16x128xi1>
    %18 = vector.broadcast %cst_8 : f32 to vector<16x128xf32>
    %19 = arith.select %17, %7, %18 : vector<16x128xi1>, vector<16x128xf32>
    %cst_9 = arith.constant dense<0.000000e+00> : vector<128xf32>
    %20 = vector.multi_reduction <add>, %19, %cst_9 [0] : vector<16x128xf32> to vector<128xf32>
    %21 = vector.shape_cast %20 : vector<128xf32> to vector<1x128xf32>
    %22 = arith.mulf %19, %19 : vector<16x128xf32>
    %cst_10 = arith.constant dense<0.000000e+00> : vector<128xf32>
    %23 = vector.multi_reduction <add>, %22, %cst_10 [0] : vector<16x128xf32> to vector<128xf32>
    %24 = vector.shape_cast %23 : vector<128xf32> to vector<1x128xf32>
    %25 = tpu.iota {dimensions = array<i32: 0>} : vector<8x1xi32>
    %c0_i32 = arith.constant 0 : i32
    %26 = vector.broadcast %c0_i32 : i32 to vector<8x1xi32>
    %27 = arith.cmpi eq, %25, %26 : vector<8x1xi32>
    %c1_i32 = arith.constant 1 : i32
    %28 = vector.broadcast %c1_i32 : i32 to vector<8x1xi32>
    %29 = arith.cmpi eq, %25, %28 : vector<8x1xi32>
    %cst_11 = arith.constant 0.000000e+00 : f32
    %30 = vector.shape_cast %29 : vector<8x1xi1> to vector<8x1xi1>
    %31 = vector.broadcast %30 : vector<8x1xi1> to vector<8x128xi1>
    %32 = vector.shape_cast %24 : vector<1x128xf32> to vector<1x128xf32>
    %33 = vector.broadcast %32 : vector<1x128xf32> to vector<8x128xf32>
    %34 = vector.broadcast %cst_11 : f32 to vector<8x128xf32>
    %35 = arith.select %31, %33, %34 : vector<8x128xi1>, vector<8x128xf32>
    %36 = vector.shape_cast %27 : vector<8x1xi1> to vector<8x1xi1>
    %37 = vector.broadcast %36 : vector<8x1xi1> to vector<8x128xi1>
    %38 = vector.shape_cast %21 : vector<1x128xf32> to vector<1x128xf32>
    %39 = vector.broadcast %38 : vector<1x128xf32> to vector<8x128xf32>
    %40 = arith.select %37, %39, %35 : vector<8x128xi1>, vector<8x128xf32>
    %c0_12 = arith.constant 0 : index
    %c0_13 = arith.constant 0 : index
    %c0_14 = arith.constant 0 : index
    %41 = vector.load %arg6[%c0_12, %c0_13, %c0_14] : memref<1x8x128xf32, #tpu.memory_space<vmem>>, vector<1x8x128xf32>
    %42 = vector.shape_cast %41 : vector<1x8x128xf32> to vector<8x128xf32>
    %43 = vector.shape_cast %40 : vector<8x128xf32> to vector<1x8x128xf32>
    tpu.vector_store %arg6[%c0_12, %c0_13, %c0_14], %43 {strides = array<i32>} : memref<1x8x128xf32, #tpu.memory_space<vmem>>, vector<1x8x128xf32>,
    return
  }
  func.func @transform_0(%arg0: i32, %arg1: i32) -> (i32, i32) {
    %c0_i32 = arith.constant 0 : i32
    %c0_i32_0 = arith.constant 0 : i32
    return %arg0, %c0_i32 : i32, i32
  }
  func.func @transform_1(%arg0: i32, %arg1: i32) -> (i32, i32) {
    %c0_i32 = arith.constant 0 : i32
    %c0_i32_0 = arith.constant 0 : i32
    return %c0_i32, %arg1 : i32, i32
  }
  func.func @transform_2(%arg0: i32, %arg1: i32) -> (i32, i32) {
    %c0_i32 = arith.constant 0 : i32
    %c0_i32_0 = arith.constant 0 : i32
    return %c0_i32, %arg1 : i32, i32
  }
  func.func @transform_3(%arg0: i32, %arg1: i32) -> (i32, i32) {
    %c0_i32 = arith.constant 0 : i32
    return %arg0, %arg1 : i32, i32
  }
  func.func @transform_4(%arg0: i32, %arg1: i32) -> (i32, i32, i32) {
    %c0_i32 = arith.constant 0 : i32
    %c0_i32_0 = arith.constant 0 : i32
    return %arg0, %c0_i32, %arg1 : i32, i32, i32
  }
}

module attributes {stable_mosaic.version = 11 : i64} {
  func.func @_matmul_act_kernel(%arg0: i32, %arg1: i32, %arg2: memref<64x256xbf16, #tpu.memory_space<vmem>>, %arg3: memref<256x128xbf16, #tpu.memory_space<vmem>>, %arg4: memref<1x128xf32, #tpu.memory_space<vmem>>, %arg5: memref<64x128xbf16, #tpu.memory_space<vmem>>) attributes {dimension_semantics = [#tpu.dimension_semantics<parallel>, #tpu.dimension_semantics<parallel>], iteration_bounds = array<i64: 2, 1>, scalar_prefetch = 0 : i64, scratch_operands = 0 : i64, tpu.core_type = #tpu.core_type<tc>, window_params = [{transform_indices = @transform_0, window_bounds = array<i64: 64, 256>}, {transform_indices = @transform_1, window_bounds = array<i64: 256, 128>}, {transform_indices = @transform_2, window_bounds = array<i64: 1, 128>}, {transform_indices = @transform_3, window_bounds = array<i64: 64, 128>}]} {
    %c0 = arith.constant 0 : index
    %c0_0 = arith.constant 0 : index
    %0 = vector.load %arg2[%c0, %c0_0] : memref<64x256xbf16, #tpu.memory_space<vmem>>, vector<64x256xbf16>
    %c0_1 = arith.constant 0 : index
    %c0_2 = arith.constant 0 : index
    %1 = vector.load %arg3[%c0_1, %c0_2] : memref<256x128xbf16, #tpu.memory_space<vmem>>, vector<256x128xbf16>
    %cst = arith.constant dense<0.000000e+00> : vector<64x128xf32>
    %2 = tpu.matmul %0, %1, %cst {dimension_numbers = #tpu.dot_dimension_numbers<[1], [0], [0], [1], [0, 0, 1, 1], [], []>} : vector<64x256xbf16>, vector<256x128xbf16>, vector<64x128xf32> -> vector<64x128xf32>
    %c0_3 = arith.constant 0 : index
    %c0_4 = arith.constant 0 : index
    %3 = vector.load %arg4[%c0_3, %c0_4] : memref<1x128xf32, #tpu.memory_space<vmem>>, vector<1x128xf32>
    %4 = vector.broadcast %3 : vector<1x128xf32> to vector<64x128xf32>
    %5 = arith.addf %2, %4 : vector<64x128xf32>
    %cst_5 = arith.constant 0.000000e+00 : f32
    %6 = vector.broadcast %cst_5 : f32 to vector<64x128xf32>
    %7 = arith.subf %6, %5 : vector<64x128xf32>
    %8 = math.exp %7 : vector<64x128xf32>
    %cst_6 = arith.constant 1.000000e+00 : f32
    %9 = vector.broadcast %cst_6 : f32 to vector<64x128xf32>
    %10 = arith.addf %9, %8 : vector<64x128xf32>
    %cst_7 = arith.constant 1.000000e+00 : f32
    %11 = vector.broadcast %cst_7 : f32 to vector<64x128xf32>
    %12 = arith.divf %11, %10 : vector<64x128xf32>
    %13 = arith.truncf %12 : vector<64x128xf32> to vector<64x128xbf16>
    %c0_8 = arith.constant 0 : index
    %c0_9 = arith.constant 0 : index
    %14 = vector.load %arg5[%c0_8, %c0_9] : memref<64x128xbf16, #tpu.memory_space<vmem>>, vector<64x128xbf16>
    tpu.vector_store %arg5[%c0_8, %c0_9], %13 {strides = array<i32>} : memref<64x128xbf16, #tpu.memory_space<vmem>>, vector<64x128xbf16>,
    return
  }
  func.func @transform_0(%arg0: i32, %arg1: i32) -> (i32, i32) {
    %c0_i32 = arith.constant 0 : i32
    %c0_i32_0 = arith.constant 0 : i32
    return %arg0, %c0_i32 : i32, i32
  }
  func.func @transform_1(%arg0: i32, %arg1: i32) -> (i32, i32) {
    %c0_i32 = arith.constant 0 : i32
    %c0_i32_0 = arith.constant 0 : i32
    return %c0_i32, %arg1 : i32, i32
  }
  func.func @transform_2(%arg0: i32, %arg1: i32) -> (i32, i32) {
    %c0_i32 = arith.constant 0 : i32
    %c0_i32_0 = arith.constant 0 : i32
    return %c0_i32, %arg1 : i32, i32
  }
  func.func @transform_3(%arg0: i32, %arg1: i32) -> (i32, i32) {
    %c0_i32 = arith.constant 0 : i32
    return %arg0, %arg1 : i32, i32
  }
}

</mosaic_0001>

<bundles_post_ra>
// kernel: denoise_autoencoder_forward.4
= control target key start
LH: loop header
LB: loop body
LE: loop exit
PB: predicated region body
PF: predicated region fallthrough
CT: control target
= control target key end

     0   :  { %s899_s15 = smov 0   ;;  %s901_s16 = smov 0   ;;  %s989_s0 = inlined_call_operand.vmem [shape: bf16[128,72], index: 0, kind: input, shape index: {}]   ;;  %s990_s1 = inlined_call_operand.vmem [shape: bf16[72,128], index: 1, kind: input, shape index: {}]   ;;  %s991_s2 = inlined_call_operand.vmem [shape: f32[1,128], index: 2, kind: input, shape index: {}]   ;;  %s992_s3 = inlined_call_operand.vmem [shape: bf16[128,128], index: 3, kind: output, shape index: {0}]   ;;  %s993_s4 = inlined_call_operand.vmem [shape: f32[2,8,128], index: 4, kind: output, shape index: {1}]  }
   0x1   :  { %s903_s17 = smov 0  }
   0x2 LB: > { %s27_s18 = sadd.s32 1, %s868_s16  ;;  %p716_p0 = scmp.ge.s32.totalorder %s872_s17, 1  ;;  %s872_s17 = sphi %s903_s17, %s15_s17   ;;  %s868_s16 = sphi %s901_s16, %s995_s16   ;;  %s864_s15 = sphi %s899_s15, %s994_s15  }
   0x3   : > { %p29_p1 = scmp.ge.s32.totalorder %s27_s18, 2  ;;  %p199_p2 = scmp.lt.s32.totalorder %s872_s17, 3 }
   0x5   : > { %s997_s18 = smov (%p29_p1, %s27_s18), 0  ;;  %p200_p3 = pnand %p716_p0, %p199_p2 }
   0x6   : > { %s717_s23 = sshll.u32 (!%p200_p3), %s864_s15, 3  ;;  %s744_s8 = sshll.u32 (!%p200_p3), %s864_s15, 6 }
   0x7   : > { %203 = sbr.rel (%p200_p3) target bundleno = 268 (0x10c), region = 32  ;;  %p243_p4 = scmp.lt.s32.totalorder (!%p200_p3), %s717_s23, 15 }
   0x8   : > { %p264_p5 = scmp.lt.s32.totalorder (!%p200_p3), %s864_s15, 1 }
   0xc   : > { %v841_v0 = vld [vmem:[%s990_s1 + $0x20] ss:$0 sps:$4 sm:$0xff]   ;;  %vm356_vm0 = vcmask 1043456   ;;  %v842_v1 = vld [vmem:[%s990_s1 + $0x18] sm:$0xff]   ;;  %v843_v3 = vld [vmem:[%s990_s1 + $0x10] sm:$0xff]   ;;  %s999_s23 = smov (!%p243_p4, %s717_s23), 15  ;;  %v474_v10 = vlaneseq  ;;  %v483_v13 = vstv %s744_s8 }
   0xd   : > { %815 = vmatprep.subr.msk.bf16.mxu0 %vm356_vm0, %v841_v0  ;;  %v358_v2 = vsel %vm356_vm0, %v841_v0, 0  ;;  %816 = vmatprep.subr.msk.bf16.mxu1 %vm356_vm0, %v841_v0  ;;  %v844_v4 = vld [vmem:[%s990_s1 + $0x8] sm:$0xff]   ;;  %s718_s28 = sshll.u32 %s999_s23, 2  ;;  %vm343_vm1 = vcmask 588800   ;;  %v845_v6 = vld [vmem:[%s990_s1] sm:$0xff]   ;;  %s1001_s15 = smov (!%p264_p5, %s864_s15), 1 }
   0xe   : > { %788 = vmatpush3.bf16.msra.mxu0 %v358_v2  ;;  %810 = vmatpush3.bf16.msra.mxu1 %v358_v2  ;;  %s246_s5 = scalar_lea.vmem %s989_s0, %s718_s28  ;;  %v947_v11 = vshrl.u32 %v474_v10, 7  ;;  %v722_v15 = vld [vmem:[%s991_s2] ss:$0 sm:$0xff]  ;;  %s262_s13 = scalar_lea.vmem %s992_s3, %s718_s28 }
   0xf   : > { %789 = vmatprep.subr.bf16.mxu0 %v842_v1  ;;  %806 = vmatprep.subr.bf16.mxu1 %v842_v1  ;;  %v846_v5 = vld [vmem:[%s246_s5] sm:$0xff]   ;;  %v848_v7 = vld [vmem:[%s246_s5 + $0x10] sm:$0xff]   ;;  %v847_v8 = vld [vmem:[%s246_s5 + $0x8] sm:$0xff]   ;;  %s721_s14 = sshll.u32 %s1001_s15, 3 }
  0x10   : > { %797 = vmatprep.mubr.msk.bf16.mxu0 %vm343_vm1, %v846_v5  ;;  %801 = vmatprep.mubr.msk.bf16.mxu1 %vm343_vm1, %v848_v7  ;;  %v849_v9 = vld [vmem:[%s246_s5 + $0x18] sm:$0xff]   ;;  %v477_v12 = vadd.s32 16, %v947_v11  ;;  %v478_v18 = vadd.s32 24, %v947_v11  ;;  %v476_v19 = vadd.s32 8, %v947_v11  ;;  %v484_v20 = vadd.s32 %v483_v13, %v947_v11  ;;  %s270_s21 = scalar_lea.vmem %s993_s4, %s721_s14 }
  0x11   : > { %v479_v24 = vadd.s32 32, %v947_v11  ;;  %v481_v33 = vadd.s32 48, %v947_v11  ;;  %v480_v40 = vadd.s32 40, %v947_v11  ;;  %v482_v50 = vadd.s32 56, %v947_v11 }
  0x12   : > { %790 = vmatpush3.bf16.msra.mxu0 %v842_v1  ;;  %811 = vmatpush3.bf16.msra.mxu1 %v842_v1  ;;  %v486_v16 = vadd.s32 %v483_v13, %v477_v12  ;;  %v487_v28 = vadd.s32 %v483_v13, %v478_v18  ;;  %v485_v30 = vadd.s32 %v483_v13, %v476_v19  ;;  %vm492_vm3 = vcmp.lt.s32.totalorder %v484_v20, 128 }
  0x13   : > { %791 = vmatprep.subr.bf16.mxu0 %v843_v3  ;;  %807 = vmatprep.subr.bf16.mxu1 %v843_v3  ;;  %v488_v36 = vadd.s32 %v483_v13, %v479_v24  ;;  %v490_v51 = vadd.s32 %v483_v13, %v481_v33  ;;  %v489_v54 = vadd.s32 %v483_v13, %v480_v40  ;;  %vm559_vm10 = vcmp.eq.s32.totalorder %v947_v11, 1 }
  0x14   : > { %vm494_vm2 = vcmp.lt.s32.totalorder %v486_v16, 128  ;;  %vm495_vm4 = vcmp.lt.s32.totalorder %v487_v28, 128  ;;  %vm493_vm5 = vcmp.lt.s32.totalorder %v485_v30, 128  ;;  %v491_v63 = vadd.s32 %v483_v13, %v482_v50 }
  0x15   : > { %vm496_vm6 = vcmp.lt.s32.totalorder %v488_v36, 128  ;;  %vm497_vm7 = vcmp.lt.s32.totalorder %v489_v54, 128  ;;  %vm498_vm8 = vcmp.lt.s32.totalorder %v490_v51, 128  ;;  %vm558_vm11 = vcmp.eq.s32.totalorder %v947_v11, 0 }
  0x16   : > { %792 = vmatpush3.bf16.msra.mxu0 %v843_v3  ;;  %812 = vmatpush3.bf16.msra.mxu1 %v843_v3  ;;  %vm499_vm9 = vcmp.lt.s32.totalorder %v491_v63, 128 }
  0x17   : > { %793 = vmatprep.subr.bf16.mxu0 %v844_v4  ;;  %808 = vmatprep.subr.bf16.mxu1 %v844_v4 }
  0x1a   : > { %794 = vmatpush3.bf16.msra.mxu0 %v844_v4  ;;  %813 = vmatpush3.bf16.msra.mxu1 %v844_v4 }
  0x1b   : > { %795 = vmatprep.subr.bf16.mxu0 %v845_v6  ;;  %809 = vmatprep.subr.bf16.mxu1 %v845_v6 }
  0x1e   : > { %796 = vmatpush3.bf16.msra.mxu0 %v845_v6  ;;  %814 = vmatpush3.bf16.msra.mxu1 %v845_v6 }
  0x21   : > { %798 = vmatmul.mubr.msk.bf16.vlgmr.msra.gmra.mxu0 %vm343_vm1, %v847_v8  ;;  %802 = vmatmul.mubr.msk.bf16.vlgmr.msra.gmra.mxu1 %vm343_vm1, %v849_v9 }
  0xe1   : > { %v799_v14 = vpop.f32.mrf.mxu0  ;;  %v803_v17 = vpop.f32.mrf.mxu1 }
  0xe2   : > { %v957_v22 = vadd.f32 %v803_v17, %v722_v15  ;;  %v403_v25 = vadd.f32 %v799_v14, %v722_v15 }
  0xe3   : > { %v394_v21 = vpop.f32.mrf.mxu0  ;;  %v410_v23 = vpop.f32.mrf.mxu1 }
  0xe4   : > { %v395_v26 = vadd.f32 %v722_v15, %v394_v21  ;;  %v411_v29 = vadd.f32 %v722_v15, %v410_v23  ;;  %v431_v35 = vmax.f32 %v957_v22, 0.0  ;;  %v427_v41 = vmax.f32 %v403_v25, 0.0 }
  0xe5   : > { %v800_v27 = vpop.f32.mrf.mxu0  ;;  %v804_v31 = vpop.f32.mrf.mxu1 }
  0xe6   : > { %v425_v32 = vmax.f32 %v395_v26, 0.0  ;;  %v406_v34 = vadd.f32 %v800_v27, %v722_v15  ;;  %v422_v38 = vadd.f32 %v804_v31, %v722_v15  ;;  %v429_v45 = vmax.f32 %v411_v29, 0.0 }
  0xe7   : > { %v397_v37 = vpop.f32.mrf.mxu0  ;;  %v413_v39 = vpop.f32.mrf.mxu1  ;;  %v518_v55 = vsel %vm494_vm2, %v427_v41, 0.0  ;;  %v522_v12 = vsel %vm498_vm8, %v431_v35, 0.0 }
  0xe8   : > { %v428_v42 = vmax.f32 %v406_v34, 0.0  ;;  %v398_v43 = vadd.f32 %v722_v15, %v397_v37  ;;  %v414_v44 = vadd.f32 %v722_v15, %v413_v39  ;;  %v432_v46 = vmax.f32 %v422_v38, 0.0 }
  0xe9   : > { %v516_v47 = vsel %vm492_vm3, %v425_v32, 0.0  ;;  %v539_v0 = vmul.f32 %v518_v55, %v518_v55  ;;  %v520_v3 = vsel %vm496_vm6, %v429_v45, 0.0  ;;  %v543_v17 = vmul.f32 %v522_v12, %v522_v12 }
  0xea   : > { %v763_v48 = vpack.c.bf16 %v428_v42, %v427_v41  ;;  %v426_v49 = vmax.f32 %v398_v43, 0.0  ;;  %v773_v52 = vpack.c.bf16 %v432_v46, %v431_v35  ;;  %v430_v53 = vmax.f32 %v414_v44, 0.0 }
  0xeb   : > { %v537_v58 = vmul.f32 %v516_v47, %v516_v47  ;;  %v519_v62 = vsel %vm495_vm4, %v428_v42, 0.0  ;;  %v541_v8 = vmul.f32 %v520_v3, %v520_v3  ;;  %v523_v16 = vsel %vm499_vm9, %v432_v46, 0.0 }
  0xec   : > { %775 = vst [vmem:[%s262_s13 + $0x8] sm:$0xff] %v763_v48   ;;  %v758_v56 = vpack.c.bf16 %v426_v49, %v425_v32  ;;  %v517_v57 = vsel %vm493_vm5, %v426_v49, 0.0  ;;  %777 = vst [vmem:[%s262_s13 + $0x18] sm:$0xff] %v773_v52   ;;  %v768_v61 = vpack.c.bf16 %v430_v53, %v429_v45  ;;  %v540_v4 = vmul.f32 %v519_v62, %v519_v62 }
  0xed   : > { %v524_v59 = vadd.f32 %v517_v57, %v516_v47  ;;  %v538_v60 = vmul.f32 %v517_v57, %v517_v57  ;;  %v521_v7 = vsel %vm497_vm7, %v430_v53, 0.0  ;;  %v544_v20 = vmul.f32 %v523_v16, %v523_v16 }
  0xee   : > { %759 = vst [vmem:[%s262_s13] sm:$0xff] %v758_v56   ;;  %776 = vst [vmem:[%s262_s13 + $0x10] sm:$0xff] %v768_v61   ;;  %v542_v13 = vmul.f32 %v521_v7, %v521_v7 }
  0xef   : > { %v525_v1 = vadd.f32 %v524_v59, %v518_v55  ;;  %v545_v2 = vadd.f32 %v538_v60, %v537_v58 }
  0xf1   : > { %v546_v5 = vadd.f32 %v545_v2, %v539_v0  ;;  %v526_v6 = vadd.f32 %v525_v1, %v519_v62 }
  0xf3   : > { %v527_v9 = vadd.f32 %v526_v6, %v520_v3  ;;  %v547_v10 = vadd.f32 %v546_v5, %v540_v4 }
  0xf5   : > { %v528_v14 = vadd.f32 %v527_v9, %v521_v7  ;;  %v548_v15 = vadd.f32 %v547_v10, %v541_v8 }
  0xf7   : > { %v529_v18 = vadd.f32 %v528_v14, %v522_v12  ;;  %v549_v19 = vadd.f32 %v548_v15, %v542_v13 }
  0xf9   : > { %v530_v21 = vadd.f32 %v529_v18, %v523_v16  ;;  %v550_v22 = vadd.f32 %v549_v19, %v543_v17 }
  0xfb   : > { %v531_v23 = vrot.slane %v530_v21, 4  ;;  %v551_v24 = vadd.f32 %v550_v22, %v544_v20 }
  0xfd   : > { %v532_v25 = vadd.f32 %v531_v23, %v530_v21  ;;  %v552_v26 = vrot.slane %v551_v24, 4 }
  0xff   : > { %v533_v27 = vrot.slane %v532_v25, 2  ;;  %v553_v28 = vadd.f32 %v552_v26, %v551_v24 }
 0x101   : > { %v534_v29 = vadd.f32 %v533_v27, %v532_v25  ;;  %v554_v30 = vrot.slane %v553_v28, 2 }
 0x103   : > { %v555_v31 = vadd.f32 %v554_v30, %v553_v28  ;;  %v535_v32 = vrot.slane %v534_v29, 1 }
 0x105   : > { %v556_v33 = vrot.slane %v555_v31, 1  ;;  %v536_v35 = vadd.f32 %v535_v32, %v534_v29 }
 0x107   : > { %v557_v34 = vadd.f32 %v556_v33, %v555_v31 }
 0x109   : > { %v562_v36 = vsel %vm559_vm10, %v557_v34, 0.0 }
 0x10a   : > { %v565_v37 = vsel %vm558_vm11, %v536_v35, %v562_v36 }
 0x10b   : > { %566 = vst [vmem:[%s270_s21] sm:$0xff] %v565_v37 }
 0x10c PF: > { %s15_s17 = sadd.s32 1, %s872_s17   ;;  %s994_s15 = smov %s868_s16 }
 0x10d   : > { %p12_p6 = scmp.ge.s32.totalorder %s15_s17, 4   ;;  %s995_s16 = smov %s997_s18 }
 0x10f   :  { %14 = sbr.rel (!%p12_p6) target bundleno = 2 (0x2), region = 80 }

// kernel: tile.17
= control target key start
LH: loop header
LB: loop body
LE: loop exit
PB: predicated region body
PF: predicated region fallthrough
CT: control target
= control target key end

     0   :  { %s22_s0 = inlined_call_operand.vmem [shape: f32[64], index: 0, kind: input, shape index: {}]   ;;  %s23_s1 = inlined_call_operand.vmem [shape: f32[4,64], index: 1, kind: output, shape index: {}]  }
   0x1   :  { %v4_v0 = vld [vmem:[%s22_s0] ss:$0 sm:$0xff] }
   0x2   :  { %5 = vst [vmem:[%s23_s1] sm:$0xf] %v4_v0 }

// kernel: denoise_autoencoder_forward.5
= control target key start
LH: loop header
LB: loop body
LE: loop exit
PB: predicated region body
PF: predicated region fallthrough
CT: control target
= control target key end

     0   :  { %s1172_s15 = smov 0   ;;  %s1174_s16 = smov 0   ;;  %s1336_s0 = inlined_call_operand.vmem [shape: bf16[32,576], index: 0, kind: input, shape index: {}]   ;;  %s1337_s1 = inlined_call_operand.vmem [shape: bf16[576,128], index: 1, kind: input, shape index: {}]   ;;  %s1338_s2 = inlined_call_operand.vmem [shape: f32[1,128], index: 2, kind: input, shape index: {}]   ;;  %s1339_s3 = inlined_call_operand.vmem [shape: bf16[32,128], index: 3, kind: output, shape index: {0}]   ;;  %s1340_s4 = inlined_call_operand.vmem [shape: f32[2,8,128], index: 4, kind: output, shape index: {1}]  }
   0x1   :  { %s1176_s17 = smov 0  }
   0x2 LB: > { %s27_s18 = sadd.s32 1, %s1139_s16  ;;  %p929_p0 = scmp.ge.s32.totalorder %s1143_s17, 1  ;;  %s1143_s17 = sphi %s1176_s17, %s15_s17   ;;  %s1139_s16 = sphi %s1174_s16, %s1342_s16   ;;  %s1135_s15 = sphi %s1172_s15, %s1341_s15  }
   0x3   : > { %p29_p1 = scmp.ge.s32.totalorder %s27_s18, 2  ;;  %p200_p2 = scmp.lt.s32.totalorder %s1143_s17, 3 }
   0x5   : > { %s1344_s18 = smov (%p29_p1, %s27_s18), 0  ;;  %p201_p3 = pnand %p929_p0, %p200_p2 }
   0x6   : > { %s930_s25 = sshll.u32 (!%p201_p3), %s1135_s15, 1  ;;  %s980_s8 = sshll.u32 (!%p201_p3), %s1135_s15, 4 }
   0x7   : > { %204 = sbr.rel (%p201_p3) target bundleno = 282 (0x11a), region = 32  ;;  %p245_p4 = scmp.lt.s32.totalorder (!%p201_p3), %s930_s25, 3 }
   0x8   : > { %p267_p5 = scmp.lt.s32.totalorder (!%p201_p3), %s1135_s15, 1 }
   0xc   : > { %v1078_v0 = vld [vmem:[%s1337_s1 + $0x78] sm:$0xff]   ;;  %v1082_v4 = vld [vmem:[%s1337_s1 + $0x70] sm:$0xff]   ;;  %v1086_v8 = vld [vmem:[%s1337_s1 + $0x68] sm:$0xff]   ;;  %s1346_s25 = smov (!%p245_p4, %s930_s25), 3  ;;  %v1145_v33 = vmov 0.0   ;;  %vm1146_vm0 = vmmov 0   ;;  %v741_v51 = vlaneseq  ;;  %v744_v57 = vstv %s980_s8 }
   0xd   : > { %v1079_v1 = vld [vmem:[%s1337_s1 + $0x38] sm:$0xff]   ;;  %990 = vmatprep.subr.bf16.mxu0 %v1078_v0  ;;  %v1083_v5 = vld [vmem:[%s1337_s1 + $0x30] sm:$0xff]   ;;  %v1087_v9 = vld [vmem:[%s1337_s1 + $0x28] sm:$0xff]   ;;  %s1051_s27 = smul.u32 20, %s1346_s25  ;;  %vm601_vm1 = vcmask 523264   ;;  %s933_s9 = sshll.u32 %s1346_s25, 2 }
   0xe   : > { %v1080_v2 = vld [vmem:[%s1337_s1 + $0xf8] sm:$0xff]   ;;  %991 = vmatpush3.bf16.msra.mxu0 %v1079_v1  ;;  %v1084_v6 = vld [vmem:[%s1337_s1 + $0xf0] sm:$0xff]   ;;  %v1088_v10 = vld [vmem:[%s1337_s1 + $0xe8] sm:$0xff]   ;;  %v742_v56 = vshrl.u32 %v741_v51, 7  ;;  %s1348_s15 = smov (!%p267_p5, %s1135_s15), 1 }
   0xf   : > { %v1081_v3 = vld [vmem:[%s1337_s1 + $0xb8] sm:$0xff]   ;;  %1012 = vmatprep.subr.bf16.mxu1 %v1080_v2  ;;  %992 = vmatprep.subr.bf16.mxu0 %v1082_v4  ;;  %v1085_v7 = vld [vmem:[%s1337_s1 + $0xb0] sm:$0xff]   ;;  %v1089_v11 = vld [vmem:[%s1337_s1 + $0xa8] sm:$0xff]   ;;  %s1286_s12 = scalar_lea.vmem %s1336_s0, %s1051_s27  ;;  %s934_s25 = sshll.u32 %s1348_s15, 3 }
  0x10   : > { %1013 = vmatpush3.bf16.msra.mxu1 %v1081_v3  ;;  %v1090_v12 = vld [vmem:[%s1337_s1 + $0x60] sm:$0xff]   ;;  %v1094_v16 = vld [vmem:[%s1337_s1 + $0x58] sm:$0xff]   ;;  %v1098_v20 = vld [vmem:[%s1337_s1 + $0x50] sm:$0xff]   ;;  %v743_v58 = vadd.s32 8, %v742_v56  ;;  %v745_v63 = vadd.s32 %v744_v57, %v742_v56  ;;  %vm772_vm4 = vcmp.eq.s32.totalorder %v742_v56, 1  ;;  %vm771_vm5 = vcmp.eq.s32.totalorder %v742_v56, 0  ;;  %s273_s19 = scalar_lea.vmem %s1340_s4, %s934_s25 }
  0x11   : > { %1014 = vmatprep.subr.bf16.mxu1 %v1084_v6  ;;  %v1091_v13 = vld [vmem:[%s1337_s1 + $0x20] sm:$0xff]   ;;  %v1095_v17 = vld [vmem:[%s1337_s1 + $0x18] sm:$0xff]   ;;  %v1099_v21 = vld [vmem:[%s1337_s1 + $0x10] sm:$0xff]  }
  0x12   : > { %993 = vmatpush3.bf16.msra.mxu0 %v1083_v5  ;;  %v1092_v14 = vld [vmem:[%s1337_s1 + $0xe0] sm:$0xff]   ;;  %v1096_v18 = vld [vmem:[%s1337_s1 + $0xd8] sm:$0xff]   ;;  %v1100_v22 = vld [vmem:[%s1337_s1 + $0xd0] sm:$0xff]   ;;  %v746_v2 = vadd.s32 %v744_v57, %v743_v58  ;;  %vm747_vm2 = vcmp.lt.s32.totalorder %v745_v63, 32 }
  0x13   : > { %994 = vmatprep.subr.bf16.mxu0 %v1086_v8  ;;  %v1093_v15 = vld [vmem:[%s1337_s1 + $0xa0] sm:$0xff]   ;;  %v1097_v19 = vld [vmem:[%s1337_s1 + $0x98] sm:$0xff]   ;;  %v1101_v23 = vld [vmem:[%s1337_s1 + $0x90] sm:$0xff]  }
  0x14   : > { %1015 = vmatpush3.bf16.msra.mxu1 %v1085_v7  ;;  %v1102_v24 = vld [vmem:[%s1337_s1 + $0x48] sm:$0xff]   ;;  %v1106_v28 = vld [vmem:[%s1337_s1 + $0x40] sm:$0xff]   ;;  %v1116_v37 = vld [vmem:[%s1337_s1 + $0x118] sm:$0xff]   ;;  %vm748_vm3 = vcmp.lt.s32.totalorder %v746_v2, 32 }
  0x15   : > { %1016 = vmatprep.subr.bf16.mxu1 %v1088_v10  ;;  %v1103_v25 = vld [vmem:[%s1337_s1 + $0x8] sm:$0xff]   ;;  %v1107_v29 = vld [vmem:[%s1337_s1] sm:$0xff]   ;;  %v1117_v38 = vld [vmem:[%s1337_s1 + $0x110] sm:$0xff]  }
  0x16   : > { %995 = vmatpush3.bf16.msra.mxu0 %v1087_v9  ;;  %v1104_v26 = vld [vmem:[%s1337_s1 + $0xc8] sm:$0xff]   ;;  %v1108_v30 = vld [vmem:[%s1337_s1 + $0xc0] sm:$0xff]  }
  0x17   : > { %996 = vmatprep.subr.bf16.mxu0 %v1090_v12  ;;  %v1105_v27 = vld [vmem:[%s1337_s1 + $0x88] sm:$0xff]   ;;  %v1109_v31 = vld [vmem:[%s1286_s12] ss:$20 sps:$4 sm:$0xff]   ;;  %v1111_v32 = vld [vmem:[%s1286_s12 + $0x4] ss:$20 sps:$4 sm:$0xff]  }
  0x18   : > { %1017 = vmatpush3.bf16.msra.mxu1 %v1089_v11  ;;  %v1112_v34 = vld [vmem:[%s1337_s1 + $0x80] sm:$0xff]   ;;  %637 = vmatprep.mubr.bf16.mxu0 %v1111_v32  ;;  %v1113_v35 = vld [vmem:[%s1286_s12 + $0x8] ss:$20 sps:$4 sm:$0xff]  }
  0x19   : > { %1018 = vmatprep.subr.bf16.mxu1 %v1092_v14  ;;  %v1115_v36 = vld [vmem:[%s1286_s12 + $0xc] ss:$20 sps:$4 sm:$0xff]   ;;  %v1120_v41 = vld [vmem:[%s1286_s12 + $0x10] ss:$20 sps:$4 sm:$0xff]   ;;  %s265_s12 = scalar_lea.vmem %s1339_s3, %s933_s9 }
  0x1a   : > { %997 = vmatpush3.bf16.msra.mxu0 %v1091_v13  ;;  %678 = vmatprep.mubr.bf16.mxu1 %v1115_v36  ;;  %v1118_v39 = vld [vmem:[%s1337_s1 + $0x108] sm:$0xff]   ;;  %v1119_v40 = vld [vmem:[%s1337_s1 + $0x100] sm:$0xff]  }
  0x1b   : > { %998 = vmatprep.subr.bf16.mxu0 %v1094_v16  ;;  %v935_v48 = vld [vmem:[%s1338_s2] ss:$0 sm:$0xff] }
  0x1c   : > { %1019 = vmatpush3.bf16.msra.mxu1 %v1093_v15 }
  0x1d   : > { %1020 = vmatprep.subr.bf16.mxu1 %v1096_v18 }
  0x1e   : > { %999 = vmatpush3.bf16.msra.mxu0 %v1095_v17 }
  0x1f   : > { %1000 = vmatprep.subr.bf16.mxu0 %v1098_v20 }
  0x20   : > { %1021 = vmatpush3.bf16.msra.mxu1 %v1097_v19 }
  0x21   : > { %1022 = vmatprep.subr.bf16.mxu1 %v1100_v22 }
  0x22   : > { %1001 = vmatpush3.bf16.msra.mxu0 %v1099_v21 }
  0x23   : > { %1002 = vmatprep.subr.bf16.mxu0 %v1102_v24 }
  0x24   : > { %1023 = vmatpush3.bf16.msra.mxu1 %v1101_v23 }
  0x25   : > { %1024 = vmatprep.subr.bf16.mxu1 %v1104_v26 }
  0x26   : > { %1003 = vmatpush3.bf16.msra.mxu0 %v1103_v25 }
  0x27   : > { %1004 = vmatprep.subr.bf16.mxu0 %v1106_v28 }
  0x28   : > { %1025 = vmatpush3.bf16.msra.mxu1 %v1105_v27 }
  0x29   : > { %1026 = vmatprep.subr.bf16.mxu1 %v1108_v30 }
  0x2a   : > { %1005 = vmatpush3.bf16.msra.mxu0 %v1107_v29 }
  0x2b   : > { %1039 = vmatprep.subr.bf16.mxu0 %v1145_v33 }
  0x2c   : > { %1027 = vmatpush3.bf16.msra.mxu1 %v1112_v34 }
  0x2d   : > { %638 = vmatmul.mubr.bf16.vlgmr.msra.gmra.mxu0 %v1109_v31 }
  0x2e   : > { %1047 = vmatprep.mubr.msk.bf16.mxu0 %vm1146_vm0, %v1145_v33  ;;  %1040 = vmatpush3.bf16.msra.mxu0 %v1116_v37 }
  0x2f   : > { %679 = vmatmul.mubr.bf16.vlgmr.msra.gmra.mxu1 %v1113_v35  ;;  %1041 = vmatprep.subr.bf16.mxu0 %v1145_v33 }
  0x32   : > { %1042 = vmatpush3.bf16.msra.mxu0 %v1117_v38 }
  0x33   : > { %1043 = vmatprep.subr.bf16.mxu0 %v1145_v33 }
  0x36   : > { %1044 = vmatpush3.bf16.msra.mxu0 %v1118_v39 }
  0x37   : > { %1045 = vmatprep.subr.bf16.mxu0 %v1145_v33 }
  0x3a   : > { %1046 = vmatpush3.bf16.msra.mxu0 %v1119_v40 }
  0x3d   : > { %1048 = vmatmul.mubr.msk.bf16.vlgmr.msra.gmra.mxu0 %vm601_vm1, %v1120_v41 }
  0xed   : > { %v1006_v42 = vpop.f32.mrf.mxu0 }
  0xef   : > { %v1007_v43 = vpop.f32.mrf.mxu0  ;;  %v1028_v44 = vpop.f32.mrf.mxu1 }
  0xf0   : > { %v1008_v47 = vadd.f32 %v1007_v43, %v1006_v42 }
  0xf1   : > { %v1009_v45 = vpop.f32.mrf.mxu0  ;;  %v1029_v46 = vpop.f32.mrf.mxu1 }
  0xf2   : > { %v640_v52 = vadd.f32 %v1008_v47, %v935_v48  ;;  %v1030_v53 = vadd.f32 %v1029_v46, %v1028_v44 }
  0xf3   : > { %v1010_v49 = vpop.f32.mrf.mxu0  ;;  %v1031_v50 = vpop.f32.mrf.mxu1 }
  0xf4   : > { %v1011_v54 = vadd.f32 %v1010_v49, %v1009_v45  ;;  %v681_v61 = vadd.f32 %v1030_v53, %v640_v52 }
  0xf5   : > { %v1032_v55 = vpop.f32.mrf.mxu1 }
  0xf6   : > { %v643_v59 = vadd.f32 %v1011_v54, %v935_v48  ;;  %v1033_v60 = vadd.f32 %v1032_v55, %v1031_v50 }
  0xf8   : > { %v684_v4 = vadd.f32 %v1033_v60, %v643_v59 }
  0xfd   : > { %v721_v62 = vpop.f32.mrf.mxu0 }
  0xfe   : > { %v722_v0 = vadd.f32 %v721_v62, %v681_v61 }
  0xff   : > { %v1049_v1 = vpop.f32.mrf.mxu0 }
 0x100   : > { %v728_v3 = vmax.f32 %v722_v0, 0.0 }
 0x101   : > { %v724_v5 = vpop.f32.mrf.mxu0 }
 0x102   : > { %v725_v6 = vadd.f32 %v724_v5, %v684_v4  ;;  %v753_v8 = vsel %vm747_vm2, %v728_v3, 0.0 }
 0x103   : > { %v1050_v7 = vpop.f32.mrf.mxu0  ;;  %v762_v12 = vmul.f32 %v753_v8, %v753_v8 }
 0x104   : > { %v729_v9 = vmax.f32 %v725_v6, 0.0 }
 0x106   : > { %v988_v10 = vpack.c.bf16 %v729_v9, %v728_v3  ;;  %v754_v11 = vsel %vm748_vm3, %v729_v9, 0.0 }
 0x107   : > { %v755_v13 = vadd.f32 %v754_v11, %v753_v8  ;;  %v763_v14 = vmul.f32 %v754_v11, %v754_v11 }
 0x108   : > { %989 = vst [vmem:[%s265_s12] sm:$0xff] %v988_v10  }
 0x109   : > { %v756_v15 = vrot.slane %v755_v13, 4  ;;  %v764_v16 = vadd.f32 %v763_v14, %v762_v12 }
 0x10b   : > { %v757_v17 = vadd.f32 %v756_v15, %v755_v13  ;;  %v765_v18 = vrot.slane %v764_v16, 4 }
 0x10d   : > { %v758_v19 = vrot.slane %v757_v17, 2  ;;  %v766_v20 = vadd.f32 %v765_v18, %v764_v16 }
 0x10f   : > { %v759_v21 = vadd.f32 %v758_v19, %v757_v17  ;;  %v767_v22 = vrot.slane %v766_v20, 2 }
 0x111   : > { %v768_v23 = vadd.f32 %v767_v22, %v766_v20  ;;  %v760_v24 = vrot.slane %v759_v21, 1 }
 0x113   : > { %v769_v25 = vrot.slane %v768_v23, 1  ;;  %v761_v27 = vadd.f32 %v760_v24, %v759_v21 }
 0x115   : > { %v770_v26 = vadd.f32 %v769_v25, %v768_v23 }
 0x117   : > { %v775_v28 = vsel %vm772_vm4, %v770_v26, 0.0 }
 0x118   : > { %v778_v29 = vsel %vm771_vm5, %v761_v27, %v775_v28 }
 0x119   : > { %779 = vst [vmem:[%s273_s19] sm:$0xff] %v778_v29 }
 0x11a PF: > { %s15_s17 = sadd.s32 1, %s1143_s17   ;;  %s1341_s15 = smov %s1139_s16 }
 0x11b   : > { %p12_p6 = scmp.ge.s32.totalorder %s15_s17, 4   ;;  %s1342_s16 = smov %s1344_s18 }
 0x11d   :  { %14 = sbr.rel (!%p12_p6) target bundleno = 2 (0x2), region = 80 }

// kernel: denoise_autoencoder_forward.6
= control target key start
LH: loop header
LB: loop body
LE: loop exit
PB: predicated region body
PF: predicated region fallthrough
CT: control target
= control target key end

     0   :  { %s1499_s15 = smov 0   ;;  %s1501_s16 = smov 0   ;;  %s1802_s0 = inlined_call_operand.vmem [shape: bf16[32,512], index: 0, kind: input, shape index: {}]   ;;  %s1803_s1 = inlined_call_operand.vmem [shape: bf16[512,256], index: 1, kind: input, shape index: {}]   ;;  %s1804_s2 = inlined_call_operand.vmem [shape: f32[1,256], index: 2, kind: input, shape index: {}]   ;;  %s1805_s3 = inlined_call_operand.vmem [shape: bf16[32,256], index: 3, kind: output, shape index: {0}]   ;;  %s1806_s4 = inlined_call_operand.vmem [shape: f32[2,8,256], index: 4, kind: output, shape index: {1}]  }
   0x1   :  { %s1503_s17 = smov 0   ;;  %s1505_s18 = smov 0  }
   0x2   :  { %s1507_s19 = smov 0   ;;  %s1509_s20 = smov 0  }
   0x3   :  { %s1511_s21 = smov 0   ;;  %s1513_s22 = smov 0  }
   0x4   :  { %s1515_s23 = smov 0  }
   0x5 LB: > { %s1179_s24 = sadd.s32 4294967295, %s1472_s23   ;;  %s24_s25 = sadd.s32 1, %s1464_s21  ;;  %s1472_s23 = sphi %s1515_s23, %s15_s23   ;;  %s1468_s22 = sphi %s1513_s22, %s1815_s22   ;;  %s1464_s21 = sphi %s1511_s21, %s1814_s21   ;;  %s1460_s20 = sphi %s1509_s20, %s1813_s20   ;;  %s1456_s19 = sphi %s1507_s19, %s1812_s19   ;;  %s1452_s18 = sphi %s1505_s18, %s1811_s18   ;;  %s1448_s17 = sphi %s1503_s17, %s1810_s17   ;;  %s1444_s16 = sphi %s1501_s16, %s1809_s16   ;;  %s1440_s15 = sphi %s1499_s15, %s1808_s15  }
   0x6   : > { %p25_p0 = scmp.ge.s32.totalorder %s24_s25, 2  ;;  %s27_s26 = sadd.s32 1, %s1468_s22 }
   0x7   : > { %s60_s27 = sadd.s32 1, %s1452_s18  ;;  %p67_p1 = scmp.ne.s32.totalorder %s1452_s18, %s1448_s17 }
   0x8   : > { %s1817_s25 = smov (%p25_p0, %s24_s25), 0  ;;  %s1819_s26 = smov (!%p25_p0, %s27_s26), %s1468_s22 }
   0x9   : > { %s57_s28 = ssub.s32 %s1464_s21, %s1817_s25  ;;  %p68_p2 = scmp.eq.s32.totalorder %s1472_s23, 0 }
   0xa   : > { %p29_p3 = scmp.ge.s32.totalorder %s1819_s26, 2  ;;  %p58_p4 = scmp.eq.s32.totalorder %s57_s28, 0 }
   0xb   : > { %p69_p5 = por %p68_p2, %p67_p1  ;;  %s114_s29 = sadd.s32 1, %s1444_s16 }
   0xc   : > { %s1821_s26 = smov (%p29_p3, %s1819_s26), 0  ;;  %p124_p6 = scmp.ne.s32.totalorder %s1444_s16, %s1440_s15 }
   0xd   : > { %s1560_s30 = scalar_select %p58_p4, %s1452_s18, %s60_s27  }
   0xe   : > { %s109_s5 = ssub.s32 %s1468_s22, %s1821_s26  ;;  %p125_p7 = scmp.eq.s32.totalorder %s1179_s24, 3 }
   0xf   : > { %s111_s6 = sor.u32 %s109_s5, %s57_s28  ;;  %p1182_p10 = scmp.ge.s32.totalorder %s1472_s23, 4 }
  0x10   : > { %p112_p8 = scmp.eq.s32.totalorder %s111_s6, 0  ;;  %p1566_p9 = por %p125_p7, %p124_p6 }
  0x11   : > { %175 = sbr.rel (%p1182_p10) target bundleno = 68 (0x44), region = 16 }
  0x12   : > { %s1571_s8 = scalar_select %p112_p8, %s1444_s16, %s114_s29  }
  0x16   : > { %188 = sbr.rel (!%p69_p5) target bundleno = 68 (0x44), region = 24  ;;  %s190_s9 = sand.u32 (%p69_p5), 1, %s1452_s18  }
  0x17   : > { %s1184_s10 = sshll.u32 (%p69_p5), %s1464_s21, 2  ;;  %s1183_s11 = sshll.u32 (%p69_p5), %s190_s9, 8 }
  0x18   : > { %s1579_s14 = scalar_lea.vmem (%p69_p5), %s1803_s1, %s1184_s10  ;;  %s1583_s24 = scalar_lea.vmem (%p69_p5), [#allocation2], %s1183_s11 }
  0x19   : > { %v211_v0 = vld [vmem:[%s1579_s14] sm:$0xf] (%p69_p5)  ;;  %v213_v1 = vld [vmem:[%s1579_s14 + $0x8] sm:$0xf] (%p69_p5)  ;;  %v215_v2 = vld [vmem:[%s1579_s14 + $0x10] sm:$0xf] (%p69_p5) }
  0x1a   : > { %212 = vst [vmem:[%s1583_s24] sm:$0xf] (%p69_p5), %v211_v0  ;;  %214 = vst [vmem:[%s1583_s24 + $0x4] sm:$0xf] (%p69_p5), %v213_v1  ;;  %v217_v3 = vld [vmem:[%s1579_s14 + $0x18] sm:$0xf] (%p69_p5) }
  0x1b   : > { %v219_v4 = vld [vmem:[%s1579_s14 + $0x20] sm:$0xf]  ;;  %216 = vst [vmem:[%s1583_s24 + $0x8] sm:$0xf] %v215_v2  ;;  %218 = vst [vmem:[%s1583_s24 + $0xc] sm:$0xf] %v217_v3 }
  0x1c   : > { %220 = vst [vmem:[%s1583_s24 + $0x10] sm:$0xf] %v219_v4  ;;  %v221_v5 = vld [vmem:[%s1579_s14 + $0x28] sm:$0xf]  ;;  %v223_v6 = vld [vmem:[%s1579_s14 + $0x30] sm:$0xf] }
  0x1d   : > { %v225_v7 = vld [vmem:[%s1579_s14 + $0x38] sm:$0xf]  ;;  %222 = vst [vmem:[%s1583_s24 + $0x14] sm:$0xf] %v221_v5  ;;  %224 = vst [vmem:[%s1583_s24 + $0x18] sm:$0xf] %v223_v6 }
  0x1e   : > { %226 = vst [vmem:[%s1583_s24 + $0x1c] sm:$0xf] %v225_v7  ;;  %v227_v8 = vld [vmem:[%s1579_s14 + $0x40] sm:$0xf]  ;;  %v229_v9 = vld [vmem:[%s1579_s14 + $0x48] sm:$0xf] }
  0x1f   : > { %v231_v10 = vld [vmem:[%s1579_s14 + $0x50] sm:$0xf]  ;;  %228 = vst [vmem:[%s1583_s24 + $0x20] sm:$0xf] %v227_v8  ;;  %230 = vst [vmem:[%s1583_s24 + $0x24] sm:$0xf] %v229_v9 }
  0x20   : > { %232 = vst [vmem:[%s1583_s24 + $0x28] sm:$0xf] %v231_v10  ;;  %v233_v11 = vld [vmem:[%s1579_s14 + $0x58] sm:$0xf]  ;;  %v235_v12 = vld [vmem:[%s1579_s14 + $0x60] sm:$0xf] }
  0x21   : > { %v237_v13 = vld [vmem:[%s1579_s14 + $0x68] sm:$0xf]  ;;  %234 = vst [vmem:[%s1583_s24 + $0x2c] sm:$0xf] %v233_v11  ;;  %236 = vst [vmem:[%s1583_s24 + $0x30] sm:$0xf] %v235_v12 }
  0x22   : > { %238 = vst [vmem:[%s1583_s24 + $0x34] sm:$0xf] %v237_v13  ;;  %v239_v14 = vld [vmem:[%s1579_s14 + $0x70] sm:$0xf]  ;;  %v241_v15 = vld [vmem:[%s1579_s14 + $0x78] sm:$0xf] }
  0x23   : > { %v243_v16 = vld [vmem:[%s1579_s14 + $0x80] sm:$0xf]  ;;  %240 = vst [vmem:[%s1583_s24 + $0x38] sm:$0xf] %v239_v14  ;;  %242 = vst [vmem:[%s1583_s24 + $0x3c] sm:$0xf] %v241_v15 }
  0x24   : > { %244 = vst [vmem:[%s1583_s24 + $0x40] sm:$0xf] %v243_v16  ;;  %v245_v17 = vld [vmem:[%s1579_s14 + $0x88] sm:$0xf]  ;;  %v247_v18 = vld [vmem:[%s1579_s14 + $0x90] sm:$0xf] }
  0x25   : > { %v249_v19 = vld [vmem:[%s1579_s14 + $0x98] sm:$0xf]  ;;  %246 = vst [vmem:[%s1583_s24 + $0x44] sm:$0xf] %v245_v17  ;;  %248 = vst [vmem:[%s1583_s24 + $0x48] sm:$0xf] %v247_v18 }
  0x26   : > { %250 = vst [vmem:[%s1583_s24 + $0x4c] sm:$0xf] %v249_v19  ;;  %v251_v20 = vld [vmem:[%s1579_s14 + $0xa0] sm:$0xf]  ;;  %v253_v21 = vld [vmem:[%s1579_s14 + $0xa8] sm:$0xf] }
  0x27   : > { %v255_v22 = vld [vmem:[%s1579_s14 + $0xb0] sm:$0xf]  ;;  %252 = vst [vmem:[%s1583_s24 + $0x50] sm:$0xf] %v251_v20  ;;  %254 = vst [vmem:[%s1583_s24 + $0x54] sm:$0xf] %v253_v21 }
  0x28   : > { %256 = vst [vmem:[%s1583_s24 + $0x58] sm:$0xf] %v255_v22  ;;  %v257_v23 = vld [vmem:[%s1579_s14 + $0xb8] sm:$0xf]  ;;  %v259_v24 = vld [vmem:[%s1579_s14 + $0xc0] sm:$0xf] }
  0x29   : > { %v261_v25 = vld [vmem:[%s1579_s14 + $0xc8] sm:$0xf]  ;;  %258 = vst [vmem:[%s1583_s24 + $0x5c] sm:$0xf] %v257_v23  ;;  %260 = vst [vmem:[%s1583_s24 + $0x60] sm:$0xf] %v259_v24 }
  0x2a   : > { %262 = vst [vmem:[%s1583_s24 + $0x64] sm:$0xf] %v261_v25  ;;  %v263_v26 = vld [vmem:[%s1579_s14 + $0xd0] sm:$0xf]  ;;  %v265_v27 = vld [vmem:[%s1579_s14 + $0xd8] sm:$0xf] }
  0x2b   : > { %v267_v28 = vld [vmem:[%s1579_s14 + $0xe0] sm:$0xf]  ;;  %264 = vst [vmem:[%s1583_s24 + $0x68] sm:$0xf] %v263_v26  ;;  %266 = vst [vmem:[%s1583_s24 + $0x6c] sm:$0xf] %v265_v27 }
  0x2c   : > { %268 = vst [vmem:[%s1583_s24 + $0x70] sm:$0xf] %v267_v28  ;;  %v269_v29 = vld [vmem:[%s1579_s14 + $0xe8] sm:$0xf]  ;;  %v271_v30 = vld [vmem:[%s1579_s14 + $0xf0] sm:$0xf] }
  0x2d   : > { %v273_v31 = vld [vmem:[%s1579_s14 + $0xf8] sm:$0xf]  ;;  %270 = vst [vmem:[%s1583_s24 + $0x74] sm:$0xf] %v269_v29  ;;  %272 = vst [vmem:[%s1583_s24 + $0x78] sm:$0xf] %v271_v30 }
  0x2e   : > { %274 = vst [vmem:[%s1583_s24 + $0x7c] sm:$0xf] %v273_v31  ;;  %v275_v32 = vld [vmem:[%s1579_s14 + $0x100] sm:$0xf]  ;;  %v277_v33 = vld [vmem:[%s1579_s14 + $0x108] sm:$0xf] }
  0x2f   : > { %v279_v34 = vld [vmem:[%s1579_s14 + $0x110] sm:$0xf]  ;;  %276 = vst [vmem:[%s1583_s24 + $0x80] sm:$0xf] %v275_v32  ;;  %278 = vst [vmem:[%s1583_s24 + $0x84] sm:$0xf] %v277_v33 }
  0x30   : > { %280 = vst [vmem:[%s1583_s24 + $0x88] sm:$0xf] %v279_v34  ;;  %v281_v35 = vld [vmem:[%s1579_s14 + $0x118] sm:$0xf]  ;;  %v283_v36 = vld [vmem:[%s1579_s14 + $0x120] sm:$0xf] }
  0x31   : > { %v285_v37 = vld [vmem:[%s1579_s14 + $0x128] sm:$0xf]  ;;  %282 = vst [vmem:[%s1583_s24 + $0x8c] sm:$0xf] %v281_v35  ;;  %284 = vst [vmem:[%s1583_s24 + $0x90] sm:$0xf] %v283_v36 }
  0x32   : > { %286 = vst [vmem:[%s1583_s24 + $0x94] sm:$0xf] %v285_v37  ;;  %v287_v38 = vld [vmem:[%s1579_s14 + $0x130] sm:$0xf]  ;;  %v289_v39 = vld [vmem:[%s1579_s14 + $0x138] sm:$0xf] }
  0x33   : > { %v291_v40 = vld [vmem:[%s1579_s14 + $0x140] sm:$0xf]  ;;  %288 = vst [vmem:[%s1583_s24 + $0x98] sm:$0xf] %v287_v38  ;;  %290 = vst [vmem:[%s1583_s24 + $0x9c] sm:$0xf] %v289_v39 }
  0x34   : > { %292 = vst [vmem:[%s1583_s24 + $0xa0] sm:$0xf] %v291_v40  ;;  %v293_v41 = vld [vmem:[%s1579_s14 + $0x148] sm:$0xf]  ;;  %v295_v42 = vld [vmem:[%s1579_s14 + $0x150] sm:$0xf] }
  0x35   : > { %v297_v43 = vld [vmem:[%s1579_s14 + $0x158] sm:$0xf]  ;;  %294 = vst [vmem:[%s1583_s24 + $0xa4] sm:$0xf] %v293_v41  ;;  %296 = vst [vmem:[%s1583_s24 + $0xa8] sm:$0xf] %v295_v42 }
  0x36   : > { %298 = vst [vmem:[%s1583_s24 + $0xac] sm:$0xf] %v297_v43  ;;  %v299_v44 = vld [vmem:[%s1579_s14 + $0x160] sm:$0xf]  ;;  %v301_v45 = vld [vmem:[%s1579_s14 + $0x168] sm:$0xf] }
  0x37   : > { %v303_v46 = vld [vmem:[%s1579_s14 + $0x170] sm:$0xf]  ;;  %300 = vst [vmem:[%s1583_s24 + $0xb0] sm:$0xf] %v299_v44  ;;  %302 = vst [vmem:[%s1583_s24 + $0xb4] sm:$0xf] %v301_v45 }
  0x38   : > { %304 = vst [vmem:[%s1583_s24 + $0xb8] sm:$0xf] %v303_v46  ;;  %v305_v47 = vld [vmem:[%s1579_s14 + $0x178] sm:$0xf]  ;;  %v307_v48 = vld [vmem:[%s1579_s14 + $0x180] sm:$0xf] }
  0x39   : > { %v309_v49 = vld [vmem:[%s1579_s14 + $0x188] sm:$0xf]  ;;  %306 = vst [vmem:[%s1583_s24 + $0xbc] sm:$0xf] %v305_v47  ;;  %308 = vst [vmem:[%s1583_s24 + $0xc0] sm:$0xf] %v307_v48 }
  0x3a   : > { %310 = vst [vmem:[%s1583_s24 + $0xc4] sm:$0xf] %v309_v49  ;;  %v311_v50 = vld [vmem:[%s1579_s14 + $0x190] sm:$0xf]  ;;  %v313_v51 = vld [vmem:[%s1579_s14 + $0x198] sm:$0xf] }
  0x3b   : > { %v315_v52 = vld [vmem:[%s1579_s14 + $0x1a0] sm:$0xf]  ;;  %312 = vst [vmem:[%s1583_s24 + $0xc8] sm:$0xf] %v311_v50  ;;  %314 = vst [vmem:[%s1583_s24 + $0xcc] sm:$0xf] %v313_v51 }
  0x3c   : > { %316 = vst [vmem:[%s1583_s24 + $0xd0] sm:$0xf] %v315_v52  ;;  %v317_v53 = vld [vmem:[%s1579_s14 + $0x1a8] sm:$0xf]  ;;  %v319_v54 = vld [vmem:[%s1579_s14 + $0x1b0] sm:$0xf] }
  0x3d   : > { %v321_v55 = vld [vmem:[%s1579_s14 + $0x1b8] sm:$0xf]  ;;  %318 = vst [vmem:[%s1583_s24 + $0xd4] sm:$0xf] %v317_v53  ;;  %320 = vst [vmem:[%s1583_s24 + $0xd8] sm:$0xf] %v319_v54 }
  0x3e   : > { %322 = vst [vmem:[%s1583_s24 + $0xdc] sm:$0xf] %v321_v55  ;;  %v323_v56 = vld [vmem:[%s1579_s14 + $0x1c0] sm:$0xf]  ;;  %v325_v57 = vld [vmem:[%s1579_s14 + $0x1c8] sm:$0xf] }
  0x3f   : > { %v327_v58 = vld [vmem:[%s1579_s14 + $0x1d0] sm:$0xf]  ;;  %324 = vst [vmem:[%s1583_s24 + $0xe0] sm:$0xf] %v323_v56  ;;  %326 = vst [vmem:[%s1583_s24 + $0xe4] sm:$0xf] %v325_v57 }
  0x40   : > { %328 = vst [vmem:[%s1583_s24 + $0xe8] sm:$0xf] %v327_v58  ;;  %v329_v59 = vld [vmem:[%s1579_s14 + $0x1d8] sm:$0xf]  ;;  %v331_v60 = vld [vmem:[%s1579_s14 + $0x1e0] sm:$0xf] }
  0x41   : > { %v333_v61 = vld [vmem:[%s1579_s14 + $0x1e8] sm:$0xf]  ;;  %330 = vst [vmem:[%s1583_s24 + $0xec] sm:$0xf] %v329_v59  ;;  %332 = vst [vmem:[%s1583_s24 + $0xf0] sm:$0xf] %v331_v60 }
  0x42   : > { %334 = vst [vmem:[%s1583_s24 + $0xf4] sm:$0xf] %v333_v61  ;;  %v335_v62 = vld [vmem:[%s1579_s14 + $0x1f0] sm:$0xf]  ;;  %v337_v63 = vld [vmem:[%s1579_s14 + $0x1f8] sm:$0xf] }
  0x43   : > { %336 = vst [vmem:[%s1583_s24 + $0xf8] sm:$0xf] %v335_v62  ;;  %338 = vst [vmem:[%s1583_s24 + $0xfc] sm:$0xf] %v337_v63 }
  0x44 PF: > { %p1185_p11 = scmp.ge.s32.totalorder %s1472_s23, 1  ;;  %p495_p12 = scmp.lt.s32.totalorder %s1472_s23, 5 }
  0x46   : > { %p496_p13 = pnand %p1185_p11, %p495_p12 }
  0x47   : > { %s502_s27 = sand.u32 (!%p496_p13), 1, %s1448_s17   ;;  %s1188_s17 = sshll.u32 (!%p496_p13), %s1460_s20, 1 }
  0x48   : > { %499 = sbr.rel (%p496_p13) target bundleno = 338 (0x152), region = 69  ;;  %s1186_s28 = sshll.u32 (!%p496_p13), %s502_s27, 8 }
  0x49   : > { %s1714_s29 = scalar_lea.vmem (!%p496_p13), [#allocation2], %s1186_s28  ;;  %p544_p0 = scmp.lt.s32.totalorder (!%p496_p13), %s1188_s17, 3 }
  0x4a   : > { %p550_p1 = scmp.lt.s32.totalorder (!%p496_p13), %s1456_s19, 1  ;;  %s1232_s24 = sshll.u32 (!%p496_p13), %s1460_s20, 4 }
  0x4b   : > { %s530_s27 = sand.u32 (!%p496_p13), 1, %s1440_s15   ;;  %p554_p2 = scmp.lt.s32.totalorder (!%p496_p13), %s1460_s20, 1 }
  0x4c   : > { %s1187_s28 = sshll.u32 (!%p496_p13), %s530_s27, 3 }
  0x4d   : > { %v1364_v0 = vld [vmem:[%s1714_s29 + $0x78] sm:$0xff]   ;;  %v1368_v4 = vld [vmem:[%s1714_s29 + $0x70] sm:$0xff]   ;;  %v1372_v8 = vld [vmem:[%s1714_s29 + $0x68] sm:$0xff]   ;;  %s1823_s17 = smov (!%p544_p0, %s1188_s17), 3  ;;  %v945_v36 = vlaneseq  ;;  %v948_v44 = vstv %s1232_s24 }
  0x4e   : > { %v1365_v1 = vld [vmem:[%s1714_s29 + $0xf8] sm:$0xff]   ;;  %1248 = vmatprep.subr.bf16.mxu0 %v1364_v0  ;;  %v1369_v5 = vld [vmem:[%s1714_s29 + $0xf0] sm:$0xff]   ;;  %v1373_v9 = vld [vmem:[%s1714_s29 + $0xe8] sm:$0xff]   ;;  %s1239_s5 = sshll.u32 %s1823_s17, 4 }
  0x4f   : > { %v1366_v2 = vld [vmem:[%s1714_s29 + $0x38] sm:$0xff]   ;;  %1270 = vmatprep.subr.bf16.mxu1 %v1365_v1  ;;  %v1370_v6 = vld [vmem:[%s1714_s29 + $0x30] sm:$0xff]   ;;  %v1374_v10 = vld [vmem:[%s1714_s29 + $0x28] sm:$0xff]   ;;  %s548_s10 = scalar_lea.vmem %s1802_s0, %s1239_s5  ;;  %v946_v41 = vshrl.u32 %v945_v36, 7 }
  0x50   : > { %v1367_v3 = vld [vmem:[%s1714_s29 + $0xb8] sm:$0xff]   ;;  %1249 = vmatpush3.bf16.msra.mxu0 %v1366_v2  ;;  %v1371_v7 = vld [vmem:[%s1714_s29 + $0xb0] sm:$0xff]   ;;  %v1375_v11 = vld [vmem:[%s1714_s29 + $0xa8] sm:$0xff]   ;;  %s1754_s11 = scalar_select %p550_p1, %s1456_s19, 1 }
  0x51   : > { %1271 = vmatpush3.bf16.msra.mxu1 %v1367_v3  ;;  %1250 = vmatprep.subr.bf16.mxu0 %v1368_v4  ;;  %v1376_v12 = vld [vmem:[%s1714_s29 + $0x60] sm:$0xff]   ;;  %v1380_v16 = vld [vmem:[%s1714_s29 + $0x58] sm:$0xff]   ;;  %v1384_v20 = vld [vmem:[%s1714_s29 + $0x50] sm:$0xff]   ;;  %v947_v46 = vadd.s32 8, %v946_v41  ;;  %v949_v50 = vadd.s32 %v948_v44, %v946_v41  ;;  %s555_s15 = scalar_select %p554_p2, %s1460_s20, 1  ;;  %vm976_vm2 = vcmp.eq.s32.totalorder %v946_v41, 1 }
  0x52   : > { %1272 = vmatprep.subr.bf16.mxu1 %v1369_v5  ;;  %v1377_v13 = vld [vmem:[%s1714_s29 + $0xe0] sm:$0xff]   ;;  %v1381_v17 = vld [vmem:[%s1714_s29 + $0xd8] sm:$0xff]   ;;  %v1385_v21 = vld [vmem:[%s1714_s29 + $0xd0] sm:$0xff]   ;;  %s552_s14 = scalar_lea.vmem %s1804_s2, %s1754_s11  ;;  %vm975_vm3 = vcmp.eq.s32.totalorder %v946_v41, 0 }
  0x53   : > { %v1378_v14 = vld [vmem:[%s1714_s29 + $0x20] sm:$0xff]   ;;  %v1382_v18 = vld [vmem:[%s1714_s29 + $0x18] sm:$0xff]   ;;  %v1386_v22 = vld [vmem:[%s1714_s29 + $0x10] sm:$0xff]   ;;  %v950_v55 = vadd.s32 %v948_v44, %v947_v46  ;;  %vm951_vm0 = vcmp.lt.s32.totalorder %v949_v50, 32  ;;  %s1191_s17 = sshll.u32 %s555_s15, 1 }
  0x54   : > { %1251 = vmatpush3.bf16.msra.mxu0 %v1370_v6  ;;  %v1379_v15 = vld [vmem:[%s1714_s29 + $0xa0] sm:$0xff]   ;;  %v1383_v19 = vld [vmem:[%s1714_s29 + $0x98] sm:$0xff]   ;;  %v1387_v23 = vld [vmem:[%s1714_s29 + $0x90] sm:$0xff]   ;;  %s559_s5 = sadd.s32 %s1191_s17, %s1754_s11  ;;  %s1242_s11 = sshll.u32 (%p1566_p9), %s1460_s20, 2 }
  0x55   : > { %1273 = vmatpush3.bf16.msra.mxu1 %v1371_v7  ;;  %1252 = vmatprep.subr.bf16.mxu0 %v1372_v8  ;;  %v1388_v24 = vld [vmem:[%s1714_s29 + $0x48] sm:$0xff]   ;;  %v1392_v28 = vld [vmem:[%s1714_s29 + $0x40] sm:$0xff]   ;;  %vm952_vm1 = vcmp.lt.s32.totalorder %v950_v55, 32  ;;  %s1192_s6 = sshll.u32 %s559_s5, 3  ;;  %s1001_s13 = sadd.s32 (%p1566_p9), %s1456_s19, %s1242_s11 }
  0x56   : > { %1274 = vmatprep.subr.bf16.mxu1 %v1373_v9  ;;  %v1389_v25 = vld [vmem:[%s1714_s29 + $0xc8] sm:$0xff]   ;;  %v1393_v29 = vld [vmem:[%s1714_s29 + $0xc0] sm:$0xff]   ;;  %s561_s12 = scalar_lea.vmem %s1806_s4, %s1192_s6 }
  0x57   : > { %v1390_v26 = vld [vmem:[%s1714_s29 + $0x8] sm:$0xff]   ;;  %v1394_v30 = vld [vmem:[%s1714_s29] sm:$0xff]  }
  0x58   : > { %1253 = vmatpush3.bf16.msra.mxu0 %v1374_v10  ;;  %v1391_v27 = vld [vmem:[%s1714_s29 + $0x88] sm:$0xff]   ;;  %v1395_v31 = vld [vmem:[%s1714_s29 + $0x80] sm:$0xff]   ;;  %s532_s29 = scalar_lea.vmem [#allocation3], %s1187_s28 }
  0x59   : > { %1275 = vmatpush3.bf16.msra.mxu1 %v1375_v11  ;;  %1254 = vmatprep.subr.bf16.mxu0 %v1376_v12  ;;  %v1396_v32 = vld [vmem:[%s548_s10] ss:$16 sps:$4 sm:$0xff]   ;;  %v1398_v33 = vld [vmem:[%s548_s10 + $0x4] ss:$16 sps:$4 sm:$0xff]   ;;  %v1399_v34 = vld [vmem:[%s548_s10 + $0x8] ss:$16 sps:$4 sm:$0xff]  }
  0x5a   : > { %1276 = vmatprep.subr.bf16.mxu1 %v1377_v13  ;;  %v1401_v35 = vld [vmem:[%s548_s10 + $0xc] ss:$16 sps:$4 sm:$0xff]   ;;  %882 = vmatprep.mubr.bf16.mxu0 %v1398_v33  ;;  %v1193_v39 = vld [vmem:[%s552_s14] ss:$0 sm:$0xff]  ;;  %s1236_s14 = sshll.u32 (%p1566_p9), %s1001_s13, 2 }
  0x5b   : > { %923 = vmatprep.mubr.bf16.mxu1 %v1401_v35  ;;  %s1003_s28 = scalar_lea.vmem (%p1566_p9), %s1805_s3, %s1236_s14 }
  0x5c   : > { %1255 = vmatpush3.bf16.msra.mxu0 %v1378_v14 }
  0x5d   : > { %1277 = vmatpush3.bf16.msra.mxu1 %v1379_v15  ;;  %1256 = vmatprep.subr.bf16.mxu0 %v1380_v16 }
  0x5e   : > { %1278 = vmatprep.subr.bf16.mxu1 %v1381_v17 }
  0x60   : > { %1257 = vmatpush3.bf16.msra.mxu0 %v1382_v18 }
  0x61   : > { %1279 = vmatpush3.bf16.msra.mxu1 %v1383_v19  ;;  %1258 = vmatprep.subr.bf16.mxu0 %v1384_v20 }
  0x62   : > { %1280 = vmatprep.subr.bf16.mxu1 %v1385_v21 }
  0x64   : > { %1259 = vmatpush3.bf16.msra.mxu0 %v1386_v22 }
  0x65   : > { %1281 = vmatpush3.bf16.msra.mxu1 %v1387_v23  ;;  %1260 = vmatprep.subr.bf16.mxu0 %v1388_v24 }
  0x66   : > { %1282 = vmatprep.subr.bf16.mxu1 %v1389_v25 }
  0x68   : > { %1261 = vmatpush3.bf16.msra.mxu0 %v1390_v26 }
  0x69   : > { %1283 = vmatpush3.bf16.msra.mxu1 %v1391_v27  ;;  %1262 = vmatprep.subr.bf16.mxu0 %v1392_v28 }
  0x6a   : > { %1284 = vmatprep.subr.bf16.mxu1 %v1393_v29 }
  0x6c   : > { %1263 = vmatpush3.bf16.msra.mxu0 %v1394_v30 }
  0x6d   : > { %1285 = vmatpush3.bf16.msra.mxu1 %v1395_v31 }
  0x6f   : > { %883 = vmatmul.mubr.bf16.vlgmr.msra.gmra.mxu0 %v1396_v32 }
  0x70   : > { %924 = vmatmul.mubr.bf16.vlgmr.msra.gmra.mxu1 %v1399_v34 }
 0x12f   : > { %v1264_v37 = vpop.f32.mrf.mxu0 }
 0x130   : > { %v1286_v38 = vpop.f32.mrf.mxu1 }
 0x131   : > { %v1265_v40 = vpop.f32.mrf.mxu0 }
 0x132   : > { %v1266_v42 = vadd.f32 %v1265_v40, %v1264_v37  ;;  %v1287_v43 = vpop.f32.mrf.mxu1 }
 0x133   : > { %v1267_v45 = vpop.f32.mrf.mxu0  ;;  %v1288_v48 = vadd.f32 %v1287_v43, %v1286_v38 }
 0x134   : > { %v885_v47 = vadd.f32 %v1266_v42, %v1193_v39  ;;  %v1289_v49 = vpop.f32.mrf.mxu1 }
 0x135   : > { %v1268_v51 = vpop.f32.mrf.mxu0 }
 0x136   : > { %v926_v52 = vadd.f32 %v1288_v48, %v885_v47  ;;  %v1269_v53 = vadd.f32 %v1268_v51, %v1267_v45  ;;  %v1290_v54 = vpop.f32.mrf.mxu1 }
 0x137   : > { %v1291_v58 = vadd.f32 %v1290_v54, %v1289_v49 }
 0x138   : > { %v932_v56 = vmax.f32 %v926_v52, 0.0  ;;  %v888_v57 = vadd.f32 %v1269_v53, %v1193_v39 }
 0x13a   : > { %v929_v59 = vadd.f32 %v1291_v58, %v888_v57  ;;  %v957_v60 = vsel %vm951_vm0, %v932_v56, 0.0 }
 0x13b   : > { %v966_v0 = vmul.f32 %v957_v60, %v957_v60 }
 0x13c   : > { %v933_v61 = vmax.f32 %v929_v59, 0.0 }
 0x13e   : > { %v1246_v62 = vpack.c.bf16 %v933_v61, %v932_v56  ;;  %v958_v63 = vsel %vm952_vm1, %v933_v61, 0.0 }
 0x13f   : > { %v959_v1 = vadd.f32 %v958_v63, %v957_v60  ;;  %v967_v2 = vmul.f32 %v958_v63, %v958_v63 }
 0x140   : > { %1247 = vst [vmem:[%s532_s29] sm:$0xff] %v1246_v62  }
 0x141   : > { %v960_v3 = vrot.slane %v959_v1, 4  ;;  %v968_v4 = vadd.f32 %v967_v2, %v966_v0 }
 0x143   : > { %v961_v5 = vadd.f32 %v960_v3, %v959_v1  ;;  %v969_v6 = vrot.slane %v968_v4, 4 }
 0x145   : > { %v962_v7 = vrot.slane %v961_v5, 2  ;;  %v970_v8 = vadd.f32 %v969_v6, %v968_v4 }
 0x147   : > { %v963_v9 = vadd.f32 %v962_v7, %v961_v5  ;;  %v971_v10 = vrot.slane %v970_v8, 2  ;;  %v1020_v18 = vld [vmem:[%s532_s29] sm:$0xf] (%p1566_p9)  ;;  %v1022_v19 = vld [vmem:[%s532_s29 + $0x4] sm:$0xf] (%p1566_p9) }
 0x148   : > { %1021 = vst [vmem:[%s1003_s28] sm:$0xf] (%p1566_p9), %v1020_v18  ;;  %1023 = vst [vmem:[%s1003_s28 + $0x8] sm:$0xf] (%p1566_p9), %v1022_v19 }
 0x149   : > { %v972_v11 = vadd.f32 %v971_v10, %v970_v8  ;;  %v964_v12 = vrot.slane %v963_v9, 1 }
 0x14b   : > { %v973_v13 = vrot.slane %v972_v11, 1  ;;  %v965_v15 = vadd.f32 %v964_v12, %v963_v9 }
 0x14d   : > { %v974_v14 = vadd.f32 %v973_v13, %v972_v11  ;;  %998 = sbr.rel (!%p1566_p9) target bundleno = 338 (0x152), region = 77 }
 0x14f   : > { %v979_v16 = vsel %vm976_vm2, %v974_v14, 0.0 }
 0x150   : > { %v982_v17 = vsel %vm975_vm3, %v965_v15, %v979_v16 }
 0x151   : > { %983 = vst [vmem:[%s561_s12] sm:$0xff] %v982_v17 }
 0x152 PF: > { %s15_s23 = sadd.s32 1, %s1472_s23   ;;  %s1808_s15 = smov %s1444_s16 }
 0x153   : > { %p12_p3 = scmp.ge.s32.totalorder %s15_s23, 6   ;;  %s1809_s16 = smov %s1571_s8 }
 0x154   : > { %s1810_s17 = smov %s1452_s18  ;;  %s1811_s18 = smov %s1560_s30 }
 0x155   : > { %s1812_s19 = smov %s1464_s21  ;;  %s1813_s20 = smov %s1468_s22 }
 0x156   : > { %s1814_s21 = smov %s1817_s25  ;;  %s1815_s22 = smov %s1821_s26 }
 0x157   :  { %14 = sbr.rel (!%p12_p3) target bundleno = 5 (0x5), region = 167 }

// kernel: denoise_autoencoder_forward.7
= control target key start
LH: loop header
LB: loop body
LE: loop exit
PB: predicated region body
PF: predicated region fallthrough
CT: control target
= control target key end

     0   :  { %s930_s12 = smov 0   ;;  %s932_s13 = smov 0   ;;  %s1028_s0 = inlined_call_operand.vmem [shape: bf16[128,256], index: 0, kind: input, shape index: {}]   ;;  %s1029_s1 = inlined_call_operand.vmem [shape: bf16[256,128], index: 1, kind: input, shape index: {}]   ;;  %s1030_s2 = inlined_call_operand.vmem [shape: f32[1,128], index: 2, kind: input, shape index: {}]   ;;  %s1031_s3 = inlined_call_operand.vmem [shape: bf16[128,128], index: 3, kind: output, shape index: {}]  }
   0x1   :  { %s934_s14 = smov 0  }
   0x2 LB: > { %s25_s15 = sadd.s32 1, %s904_s13  ;;  %p673_p0 = scmp.ge.s32.totalorder %s908_s14, 1  ;;  %s908_s14 = sphi %s934_s14, %s13_s14   ;;  %s904_s13 = sphi %s932_s13, %s1033_s13   ;;  %s900_s12 = sphi %s930_s12, %s1032_s12  }
   0x3   : > { %p27_p1 = scmp.ge.s32.totalorder %s25_s15, 2  ;;  %p170_p2 = scmp.lt.s32.totalorder %s908_s14, 3 }
   0x5   : > { %s1035_s15 = smov (%p27_p1, %s25_s15), 0  ;;  %p171_p3 = pnand %p673_p0, %p170_p2 }
   0x6   : > { %s674_s18 = sshll.u32 (!%p171_p3), %s900_s12, 3 }
   0x7   : > { %174 = sbr.rel (%p171_p3) target bundleno = 294 (0x126), region = 32  ;;  %p206_p4 = scmp.lt.s32.totalorder (!%p171_p3), %s674_s18, 15 }
   0xc   : > { %v826_v0 = vld [vmem:[%s1029_s1 + $0x78] sm:$0xff]   ;;  %v828_v2 = vld [vmem:[%s1029_s1 + $0x70] sm:$0xff]   ;;  %v830_v4 = vld [vmem:[%s1029_s1 + $0x68] sm:$0xff]   ;;  %s1037_s18 = smov (!%p206_p4, %s674_s18), 15 }
   0xd   : > { %v827_v1 = vld [vmem:[%s1029_s1 + $0x38] sm:$0xff]   ;;  %746 = vmatprep.subr.bf16.mxu0 %v826_v0  ;;  %786 = vmatprep.subr.bf16.mxu1 %v826_v0  ;;  %v829_v3 = vld [vmem:[%s1029_s1 + $0x30] sm:$0xff]   ;;  %v831_v5 = vld [vmem:[%s1029_s1 + $0x28] sm:$0xff]   ;;  %s714_s6 = sshll.u32 %s1037_s18, 3  ;;  %s678_s5 = sshll.u32 %s1037_s18, 2 }
   0xe   : > { %747 = vmatpush3.bf16.msra.mxu0 %v827_v1  ;;  %794 = vmatpush3.bf16.msra.mxu1 %v827_v1  ;;  %v832_v6 = vld [vmem:[%s1029_s1 + $0x60] sm:$0xff]   ;;  %v834_v8 = vld [vmem:[%s1029_s1 + $0x58] sm:$0xff]   ;;  %s981_s11 = scalar_lea.vmem %s1028_s0, %s714_s6  ;;  %v836_v10 = vld [vmem:[%s1029_s1 + $0x50] sm:$0xff]   ;;  %s226_s8 = scalar_lea.vmem %s1031_s3, %s678_s5 }
   0xf   : > { %748 = vmatprep.subr.bf16.mxu0 %v828_v2  ;;  %787 = vmatprep.subr.bf16.mxu1 %v828_v2  ;;  %v833_v7 = vld [vmem:[%s1029_s1 + $0x20] sm:$0xff]   ;;  %v835_v9 = vld [vmem:[%s1029_s1 + $0x18] sm:$0xff]   ;;  %v837_v13 = vld [vmem:[%s1029_s1 + $0x10] sm:$0xff]  }
  0x10   : > { %v844_v11 = vld [vmem:[%s981_s11 + $0x4] ss:$8 sps:$4 sm:$0xff]   ;;  %v842_v18 = vld [vmem:[%s981_s11] ss:$8 sps:$4 sm:$0xff]   ;;  %v848_v20 = vld [vmem:[%s981_s11 + $0x14] ss:$8 sps:$4 sm:$0xff]  }
  0x11   : > { %v847_v12 = vld [vmem:[%s981_s11 + $0x24] ss:$8 sps:$4 sm:$0xff]   ;;  %444 = vmatprep.mubr.bf16.mxu0 %v844_v11  ;;  %v845_v19 = vld [vmem:[%s981_s11 + $0x20] ss:$8 sps:$4 sm:$0xff]   ;;  %v850_v21 = vld [vmem:[%s981_s11 + $0x34] ss:$8 sps:$4 sm:$0xff]  }
  0x12   : > { %749 = vmatpush3.bf16.msra.mxu0 %v829_v3  ;;  %795 = vmatpush3.bf16.msra.mxu1 %v829_v3  ;;  %v838_v14 = vld [vmem:[%s1029_s1 + $0x48] sm:$0xff]   ;;  %v840_v16 = vld [vmem:[%s1029_s1 + $0x40] sm:$0xff]   ;;  %v852_v22 = vld [vmem:[%s981_s11 + $0x10] ss:$8 sps:$4 sm:$0xff]  }
  0x13   : > { %750 = vmatprep.subr.bf16.mxu0 %v830_v4  ;;  %788 = vmatprep.subr.bf16.mxu1 %v830_v4  ;;  %v839_v15 = vld [vmem:[%s1029_s1 + $0x8] sm:$0xff]   ;;  %v841_v17 = vld [vmem:[%s1029_s1] sm:$0xff]   ;;  %v853_v23 = vld [vmem:[%s981_s11 + $0x30] ss:$8 sps:$4 sm:$0xff]  }
  0x14   : > { %460 = vmatprep.mubr.bf16.mxu1 %v847_v12  ;;  %v679_v26 = vld [vmem:[%s1030_s2] ss:$0 sm:$0xff] }
  0x16   : > { %751 = vmatpush3.bf16.msra.mxu0 %v831_v5  ;;  %796 = vmatpush3.bf16.msra.mxu1 %v831_v5 }
  0x17   : > { %752 = vmatprep.subr.bf16.mxu0 %v832_v6  ;;  %789 = vmatprep.subr.bf16.mxu1 %v832_v6 }
  0x1a   : > { %753 = vmatpush3.bf16.msra.mxu0 %v833_v7  ;;  %797 = vmatpush3.bf16.msra.mxu1 %v833_v7 }
  0x1b   : > { %754 = vmatprep.subr.bf16.mxu0 %v834_v8  ;;  %790 = vmatprep.subr.bf16.mxu1 %v834_v8 }
  0x1e   : > { %755 = vmatpush3.bf16.msra.mxu0 %v835_v9  ;;  %798 = vmatpush3.bf16.msra.mxu1 %v835_v9 }
  0x1f   : > { %756 = vmatprep.subr.bf16.mxu0 %v836_v10  ;;  %791 = vmatprep.subr.bf16.mxu1 %v836_v10 }
  0x22   : > { %757 = vmatpush3.bf16.msra.mxu0 %v837_v13  ;;  %799 = vmatpush3.bf16.msra.mxu1 %v837_v13 }
  0x23   : > { %758 = vmatprep.subr.bf16.mxu0 %v838_v14  ;;  %792 = vmatprep.subr.bf16.mxu1 %v838_v14 }
  0x26   : > { %759 = vmatpush3.bf16.msra.mxu0 %v839_v15  ;;  %800 = vmatpush3.bf16.msra.mxu1 %v839_v15 }
  0x27   : > { %760 = vmatprep.subr.bf16.mxu0 %v840_v16  ;;  %793 = vmatprep.subr.bf16.mxu1 %v840_v16 }
  0x2a   : > { %761 = vmatpush3.bf16.msra.mxu0 %v841_v17  ;;  %801 = vmatpush3.bf16.msra.mxu1 %v841_v17 }
  0x2d   : > { %445 = vmatmul.mubr.bf16.vlgmr.msra.gmra.mxu0 %v842_v18  ;;  %461 = vmatmul.mubr.bf16.vlgmr.msra.gmra.mxu1 %v845_v19 }
  0x2e   : > { %452 = vmatprep.mubr.bf16.mxu0 %v848_v20  ;;  %468 = vmatprep.mubr.bf16.mxu1 %v850_v21 }
  0x35   : > { %453 = vmatmul.mubr.bf16.gmra.mxu0 %v852_v22  ;;  %469 = vmatmul.mubr.bf16.gmra.mxu1 %v853_v23 }
  0xed   : > { %v762_v24 = vpop.f32.mrf.mxu0  ;;  %v774_v25 = vpop.f32.mrf.mxu1 }
  0xef   : > { %v763_v27 = vpop.f32.mrf.mxu0  ;;  %v775_v28 = vpop.f32.mrf.mxu1 }
  0xf0   : > { %v764_v29 = vadd.f32 %v763_v27, %v762_v24  ;;  %v776_v30 = vadd.f32 %v775_v28, %v774_v25 }
  0xf1   : > { %v765_v31 = vpop.f32.mrf.mxu0  ;;  %v777_v32 = vpop.f32.mrf.mxu1 }
  0xf2   : > { %v447_v33 = vadd.f32 %v764_v29, %v679_v26  ;;  %v463_v34 = vadd.f32 %v776_v30, %v679_v26 }
  0xf3   : > { %v766_v35 = vpop.f32.mrf.mxu0  ;;  %v778_v36 = vpop.f32.mrf.mxu1 }
  0xf4   : > { %v477_v37 = vsub.f32 0.0, %v447_v33  ;;  %v481_v38 = vsub.f32 0.0, %v463_v34  ;;  %v767_v39 = vadd.f32 %v766_v35, %v765_v31  ;;  %v779_v40 = vadd.f32 %v778_v36, %v777_v32 }
  0xf5   : > { %v768_v41 = vpop.f32.mrf.mxu0  ;;  %v780_v42 = vpop.f32.mrf.mxu1 }
  0xf6   : > { %v485_v43 = vmul.f32 1.442695, %v477_v37  ;;  %v493_v44 = vmul.f32 1.442695, %v481_v38  ;;  %v450_v45 = vadd.f32 %v767_v39, %v679_v26  ;;  %v466_v46 = vadd.f32 %v779_v40, %v679_v26 }
  0xf7   : > { %v769_v47 = vpop.f32.mrf.mxu0  ;;  %v781_v48 = vpop.f32.mrf.mxu1 }
  0xf8   : > { %854 = vpow2.f32 %v485_v43  ;;  %v478_v49 = vsub.f32 0.0, %v450_v45  ;;  %v482_v50 = vsub.f32 0.0, %v466_v46  ;;  %v770_v51 = vadd.f32 %v769_v47, %v768_v41 }
  0xf9   : > { %856 = vpow2.f32 %v493_v44  ;;  %v782_v52 = vadd.f32 %v781_v48, %v780_v42  ;;  %v771_v53 = vpop.f32.mrf.mxu0  ;;  %v783_v54 = vpop.f32.mrf.mxu1 }
  0xfa   : > { %v487_v55 = vmul.f32 1.442695, %v478_v49  ;;  %v495_v56 = vmul.f32 1.442695, %v482_v50  ;;  %v455_v57 = vadd.f32 %v770_v51, %v679_v26 }
  0xfb   : > { %v471_v58 = vadd.f32 %v782_v52, %v679_v26  ;;  %v772_v59 = vpop.f32.mrf.mxu0  ;;  %v784_v60 = vpop.f32.mrf.mxu1 }
  0xfc   : > { %858 = vpow2.f32 %v487_v55  ;;  %v479_v61 = vsub.f32 0.0, %v455_v57  ;;  %v773_v62 = vadd.f32 %v772_v59, %v771_v53  ;;  %v785_v63 = vadd.f32 %v784_v60, %v783_v54 }
  0xfd   : > { %860 = vpow2.f32 %v495_v56  ;;  %v483_v0 = vsub.f32 0.0, %v471_v58 }
  0xfe   : > { %v489_v1 = vmul.f32 1.442695, %v479_v61  ;;  %v458_v2 = vadd.f32 %v773_v62, %v679_v26  ;;  %v474_v3 = vadd.f32 %v785_v63, %v679_v26 }
  0xff   : > { %v497_v4 = vmul.f32 1.442695, %v483_v0 }
 0x100   : > { %862 = vpow2.f32 %v489_v1  ;;  %v480_v5 = vsub.f32 0.0, %v458_v2  ;;  %v484_v6 = vsub.f32 0.0, %v474_v3 }
 0x101   : > { %864 = vpow2.f32 %v497_v4 }
 0x102   : > { %v491_v7 = vmul.f32 1.442695, %v480_v5  ;;  %v499_v8 = vmul.f32 1.442695, %v484_v6 }
 0x104   : > { %866 = vpow2.f32 %v491_v7 }
 0x105   : > { %v855_v9 = vpop.eup %854  ;;  %868 = vpow2.f32 %v499_v8 }
 0x106   : > { %v857_v10 = vpop.eup %856  ;;  %v501_v11 = vadd.f32 1.0, %v855_v9 }
 0x107   : > { %v505_v12 = vadd.f32 1.0, %v857_v10 }
 0x108   : > { %870 = vrcp.f32 %v501_v11 }
 0x109   : > { %v859_v13 = vpop.eup %858  ;;  %872 = vrcp.f32 %v505_v12 }
 0x10a   : > { %v861_v14 = vpop.eup %860  ;;  %v502_v15 = vadd.f32 1.0, %v859_v13 }
 0x10b   : > { %v506_v16 = vadd.f32 1.0, %v861_v14 }
 0x10c   : > { %874 = vrcp.f32 %v502_v15 }
 0x10d   : > { %v863_v17 = vpop.eup %862  ;;  %876 = vrcp.f32 %v506_v16 }
 0x10e   : > { %v865_v18 = vpop.eup %864  ;;  %v503_v19 = vadd.f32 1.0, %v863_v17 }
 0x10f   : > { %v507_v20 = vadd.f32 1.0, %v865_v18 }
 0x110   : > { %878 = vrcp.f32 %v503_v19 }
 0x111   : > { %v867_v21 = vpop.eup %866  ;;  %880 = vrcp.f32 %v507_v20 }
 0x112   : > { %v869_v22 = vpop.eup %868  ;;  %v504_v23 = vadd.f32 1.0, %v867_v21 }
 0x113   : > { %v508_v24 = vadd.f32 1.0, %v869_v22 }
 0x114   : > { %882 = vrcp.f32 %v504_v23 }
 0x115   : > { %884 = vrcp.f32 %v508_v24  ;;  %v871_v25 = vpop.eup %870 }
 0x116   : > { %v873_v26 = vpop.eup %872 }
 0x119   : > { %v875_v27 = vpop.eup %874 }
 0x11a   : > { %v877_v28 = vpop.eup %876  ;;  %v726_v29 = vpack.c.bf16 %v875_v27, %v871_v25 }
 0x11b   : > { %v736_v30 = vpack.c.bf16 %v877_v28, %v873_v26 }
 0x11c   : > { %727 = vst [vmem:[%s226_s8] sm:$0xff] %v726_v29  }
 0x11d   : > { %744 = vst [vmem:[%s226_s8 + $0x10] sm:$0xff] %v736_v30   ;;  %v879_v31 = vpop.eup %878 }
 0x11e   : > { %v881_v32 = vpop.eup %880 }
 0x121   : > { %v883_v33 = vpop.eup %882 }
 0x122   : > { %v885_v34 = vpop.eup %884  ;;  %v731_v35 = vpack.c.bf16 %v883_v33, %v879_v31 }
 0x123   : > { %v741_v36 = vpack.c.bf16 %v885_v34, %v881_v32 }
 0x124   : > { %743 = vst [vmem:[%s226_s8 + $0x8] sm:$0xff] %v731_v35  }
 0x125   : > { %745 = vst [vmem:[%s226_s8 + $0x18] sm:$0xff] %v741_v36  }
 0x126 PF: > { %s13_s14 = sadd.s32 1, %s908_s14   ;;  %s1032_s12 = smov %s904_s13 }
 0x127   : > { %p10_p5 = scmp.ge.s32.totalorder %s13_s14, 4   ;;  %s1033_s13 = smov %s1035_s15 }
 0x129   :  { %12 = sbr.rel (!%p10_p5) target bundleno = 2 (0x2), region = 68 }

</bundles_post_ra>
